<compile_context>
chip_gen: v7x
topology: tpu7x:2x2x1
jax: 0.10.0
libtpu: 0.0.40
codegen_flags: <defaults>
</compile_context>

<pallas_src>
import functools

import jax
import jax.numpy as jnp
import numpy as np
from jax.experimental import pallas as pl
from jax.experimental.pallas import tpu as pltpu


def _sigmoid1(x):
    """Single-EUP sigmoid: 0.5 * tanh(0.5 * x) + 0.5 (== logistic exactly)."""
    return 0.5 * jnp.tanh(0.5 * x) + 0.5


# ----------------------------------------------------------------------------
# Fused kernel: all LSTM layers + FC + sigmoid in one invocation (no grid).
# ----------------------------------------------------------------------------
def _classifier_kernel(gx0_ref,      # (T*Bp, 4H)  layer-0 gates (bias folded in)
                       w_ih_ref,     # (max(L-1,1), H, 4H)  layer>=1 input weights
                       w_hh_ref,     # (L, H, 4H)
                       b_ref,        # (L, 1, 4H)   combined b_ih + b_hh
                       h0_ref,       # (L, Bp, H)
                       c0_ref,       # (L, Bp, H)
                       w_fc_ref,     # (H, 1)       only the needed output column
                       b_fc_ref,     # (1, 1)
                       out_ref,      # (Bp, 1)
                       h_n_ref,      # (L, Bp, H)
                       c_n_ref,      # (L, Bp, H)
                       *scratch,     # (y_scr (T*Bp,H) f32, gx_scr (T*Bp,4H)) iff L>1
                       unroll):
    num_layers, Bp, H = h0_ref.shape
    TB = gx0_ref.shape[0]
    T = TB // Bp
    G = 4 * H

    if num_layers > 1:
        y_scr, gx_scr = scratch
    else:
        y_scr = gx_scr = None

    h_last = None
    for layer in range(num_layers):                 # static Python loop (small L)
        is_first = layer == 0
        is_last = layer == num_layers - 1

        if is_first:
            # Layer-0 projection (with bias) precomputed in the wrapper; read it
            # directly -- no copy pass over the largest buffer.
            gx_ref = gx0_ref
        else:
            # Input projection for layers >= 1, bias folded in, one tall matmul.
            w_ih_l = w_ih_ref[layer - 1]            # (H, 4H)
            bias = jnp.broadcast_to(b_ref[layer], (TB, G))
            gx_scr[...] = (jnp.dot(y_scr[...].astype(w_ih_l.dtype), w_ih_l,
                                   preferred_element_type=jnp.float32)
                           + bias).astype(gx_scr.dtype)
            gx_ref = gx_scr

        w_hh_l = w_hh_ref[layer]                    # (H, 4H) hoisted out of loop

        def step(t, carry, w_hh_l=w_hh_l, gx_ref=gx_ref, is_last=is_last):
            h_prev, c_prev = carry                  # f32 (Bp, H)
            row = pl.multiple_of(t * Bp, Bp)        # 8-aligned dynamic offset
            gates = (gx_ref[pl.ds(row, Bp), :].astype(jnp.float32)
                     + jnp.dot(h_prev.astype(w_hh_l.dtype), w_hh_l,
                               preferred_element_type=jnp.float32))
            # Stored gate order [i, f, o, g]: one contiguous sigmoid slice.
            sig = _sigmoid1(gates[:, :3 * H])
            i_g = sig[:, 0 * H:1 * H]
            f_g = sig[:, 1 * H:2 * H]
            o_g = sig[:, 2 * H:3 * H]
            g_g = jnp.tanh(gates[:, 3 * H:4 * H])
            c_new = f_g * c_prev + i_g * g_g
            h_new = o_g * jnp.tanh(c_new)
            if not is_last:
                # Final layer's sequence is never consumed -> skip the store.
                y_scr[pl.ds(row, Bp), :] = h_new
            return (h_new, c_new)

        h_fin, c_fin = jax.lax.fori_loop(
            0, T, step, (h0_ref[layer], c0_ref[layer]), unroll=unroll)
        h_n_ref[layer] = h_fin
        c_n_ref[layer] = c_fin
        if is_last:
            h_last = h_fin
        # nn.LSTM inter-layer dropout: identity in eval mode.

    # FC + sigmoid on the last timestep only (loop carry), only the needed column.
    w_fc = w_fc_ref[...]
    z = jnp.dot(h_last.astype(w_fc.dtype), w_fc,
                preferred_element_type=jnp.float32) + b_fc_ref[...]
    out_ref[...] = _sigmoid1(z)


# ----------------------------------------------------------------------------
# Parameter init mirroring Classifier.__init__ (storage layout notes below).
# ----------------------------------------------------------------------------
def init_params(key, vocab_size, hidden_dim, num_layers, output_size):
    """Storage layout (differs from PyTorch for TPU efficiency):
      * w_ih: (in_dim, 4H), w_hh: (H, 4H)  -- transposed so x @ W works directly.
      * Gate blocks along the 4H axis are ordered [i, f, o, g] (PyTorch: i,f,g,o).
      * b = b_ih + b_hh, shape (1, 4H).
    Loading a real PyTorch checkpoint requires transposing weight_ih/weight_hh
    and permuting their gate blocks from (i,f,g,o) to (i,f,o,g).
    """
    params = {"layers": []}
    k = 1.0 / np.sqrt(hidden_dim)
    for layer in range(num_layers):
        in_dim = vocab_size if layer == 0 else hidden_dim
        key, k1, k2, k3, k4 = jax.random.split(key, 5)
        w_ih = jax.random.uniform(k1, (in_dim, 4 * hidden_dim), jnp.float32, -k, k)
        w_hh = jax.random.uniform(k2, (hidden_dim, 4 * hidden_dim), jnp.float32, -k, k)
        b_ih = jax.random.uniform(k3, (4 * hidden_dim,), jnp.float32, -k, k)
        b_hh = jax.random.uniform(k4, (4 * hidden_dim,), jnp.float32, -k, k)
        params["layers"].append(
            {"w_ih": w_ih, "w_hh": w_hh, "b": (b_ih + b_hh).reshape(1, -1)})
    key, k1, k2 = jax.random.split(key, 3)
    params["w_fc"] = jax.random.uniform(k1, (hidden_dim, output_size), jnp.float32, -k, k)
    params["b_fc"] = jax.random.uniform(k2, (1, output_size), jnp.float32, -k, k)
    return params


def _nbytes(shape, dtype):
    return int(np.prod(shape)) * jnp.dtype(dtype).itemsize


# ----------------------------------------------------------------------------
# Forward-pass wrapper (glue: embedding gather, batch padding, weight stacking).
# ----------------------------------------------------------------------------
def classifier_forward(params, tokens, hidden_states, *,
                       compute_dtype=jnp.float32, unroll=None):
    """tokens: (B, T) int32; hidden_states: (h, c), each (num_layers, B, H).

    compute_dtype: dtype of the MXU matmul operands and of the large gx buffers.
    bf16 is safe and fast on v5e/v6e/v7x (gate math, cell state and matmul
    accumulation stay float32); f32 gives a bit-faithful reference path.
    Returns (output (B,), (h_n, c_n)) matching Classifier.forward in eval mode.
    """
    h0, c0 = hidden_states
    num_layers, B, H = h0.shape
    T = tokens.shape[1]
    Bp = ((B + 7) // 8) * 8          # pad batch rows to full sublanes

    # Layer-0 input projection: one_hot(tokens) @ W_ih0 == row gather of W_ih0.
    # Gather directly in (T, B, 4H) layout and fold in the layer-0 bias so the
    # kernel's layer-0 recurrence only adds h_prev @ W_hh.
    gx0 = jnp.take(params["layers"][0]["w_ih"], tokens.T, axis=0)   # (T, B, 4H)
    gx0 = gx0 + params["layers"][0]["b"]
    gx0 = jnp.pad(gx0, ((0, 0), (0, Bp - B), (0, 0)))               # (T, Bp, 4H)
    gx0 = gx0.reshape(T * Bp, 4 * H).astype(compute_dtype)

    if num_layers > 1:
        w_ih_rest = jnp.stack(
            [params["layers"][l]["w_ih"] for l in range(1, num_layers)])
    else:
        w_ih_rest = jnp.zeros((1, H, 4 * H), jnp.float32)           # unused dummy
    w_hh = jnp.stack([params["layers"][l]["w_hh"] for l in range(num_layers)])
    b = jnp.stack([params["layers"][l]["b"] for l in range(num_layers)])
    w_fc_col = params["w_fc"][:, -1:]                               # only needed column
    b_fc_col = params["b_fc"][:, -1:]

    # bf16 MXU operands (f32 accumulate); no-op when compute_dtype == f32.
    w_ih_rest = w_ih_rest.astype(compute_dtype)
    w_hh = w_hh.astype(compute_dtype)
    w_fc_col = w_fc_col.astype(compute_dtype)

    h0p = jnp.pad(h0, ((0, 0), (0, Bp - B), (0, 0)))
    c0p = jnp.pad(c0, ((0, 0), (0, Bp - B), (0, 0)))

    if unroll is None:
        unroll = True if T <= 16 else 8             # sweep {8, 16, full} for big T
    kernel = functools.partial(_classifier_kernel, unroll=unroll)
    vmem = pltpu.MemorySpace.VMEM

    scratch_shapes = []
    if num_layers > 1:
        scratch_shapes = [
            pltpu.VMEM((T * Bp, H), jnp.float32),        # per-layer output sequence
            pltpu.VMEM((T * Bp, 4 * H), compute_dtype),  # layer>=1 projected gates
        ]

    # Explicit VMEM limit sized from the actual resident tenants (don't rely on
    # the 32 MiB scoped default), with headroom, capped below v7x's 64 MiB.
    resident = (
        _nbytes((T * Bp, 4 * H), compute_dtype)                  # gx0
        + _nbytes(w_ih_rest.shape, compute_dtype)
        + _nbytes(w_hh.shape, compute_dtype)
        + _nbytes(b.shape, jnp.float32)
        + 4 * _nbytes((num_layers, Bp, H), jnp.float32)          # h0, c0, h_n, c_n
        + _nbytes((H, 1), compute_dtype)
        + _nbytes((Bp, 1), jnp.float32) + 4
    )
    if num_layers > 1:
        resident += (_nbytes((T * Bp, H), jnp.float32)
                     + _nbytes((T * Bp, 4 * H), compute_dtype))
    vmem_limit = int(min(max(2 * resident + (4 << 20), 32 << 20), 48 << 20))

    out, h_n, c_n = pl.pallas_call(
        kernel,
        out_shape=(
            jax.ShapeDtypeStruct((Bp, 1), jnp.float32),
            jax.ShapeDtypeStruct((num_layers, Bp, H), jnp.float32),
            jax.ShapeDtypeStruct((num_layers, Bp, H), jnp.float32),
        ),
        in_specs=[pl.BlockSpec(memory_space=vmem)] * 8,
        out_specs=[pl.BlockSpec(memory_space=vmem)] * 3,
        scratch_shapes=scratch_shapes,
        compiler_params=pltpu.CompilerParams(vmem_limit_bytes=vmem_limit),
    )(gx0, w_ih_rest, w_hh, b, h0p, c0p, w_fc_col, b_fc_col)

    # self.dropout: identity in eval mode.
    # torch: sigmoid(fc(all_steps)).view(B, -1)[:, -1]  == last step, last unit.
    return out[:B, 0], (h_n[:, :B, :], c_n[:, :B, :])


# ----------------------------------------------------------------------------
# Pure-JAX reference (faithful to the torch module: explicit one-hot + matmuls)
# ----------------------------------------------------------------------------
def classifier_reference(params, tokens, hidden_states):
    h_in, c_in = hidden_states
    num_layers, B, H = h_in.shape
    V = params["layers"][0]["w_ih"].shape[0]
    hp = jax.lax.Precision.HIGHEST
    x = jnp.transpose(jax.nn.one_hot(tokens, V, dtype=jnp.float32), (1, 0, 2))

    h_outs, c_outs = [], []
    for layer in range(num_layers):
        p = params["layers"][layer]

        def step(carry, x_t, p=p):
            h, c = carry
            gates = (jnp.dot(x_t, p["w_ih"], precision=hp)
                     + jnp.dot(h, p["w_hh"], precision=hp) + p["b"])
            i = jax.nn.sigmoid(gates[:, 0 * H:1 * H])
            f = jax.nn.sigmoid(gates[:, 1 * H:2 * H])
            o = jax.nn.sigmoid(gates[:, 2 * H:3 * H])
            g = jnp.tanh(gates[:, 3 * H:4 * H])
            c_new = f * c + i * g
            h_new = o * jnp.tanh(c_new)
            return (h_new, c_new), h_new

        (hT, cT), x = jax.lax.scan(step, (h_in[layer], c_in[layer]), x)
        h_outs.append(hT)
        c_outs.append(cT)

    probs = jax.nn.sigmoid(jnp.dot(x[-1], params["w_fc"], precision=hp)
                           + params["b_fc"])
    return probs[:, -1], (jnp.stack(h_outs, 0), jnp.stack(c_outs, 0))


if __name__ == "__main__":
    batch_size = 2
    sequence_length = 8
    vocab_size = 16
    hidden_dim = 32
    num_layers = 2
    output_size = 4

    key = jax.random.PRNGKey(0)
    key, k_tok = jax.random.split(key)
    tokens = jax.random.randint(k_tok, (batch_size, sequence_length), 0, vocab_size,
                                dtype=jnp.int32)
    params = init_params(key, vocab_size, hidden_dim, num_layers, output_size)

    # init_hidden_states equivalent: zeros of (num_layers, B, H)
    h0 = jnp.zeros((num_layers, batch_size, hidden_dim), jnp.float32)
    c0 = jnp.zeros((num_layers, batch_size, hidden_dim), jnp.float32)

    # f32 path (bit-faithful reference check)
    out, (h_n, c_n) = classifier_forward(params, tokens, (h0, c0))
    out = jax.block_until_ready(out)
    h_n = jax.block_until_ready(h_n)
    c_n = jax.block_until_ready(c_n)

    ref_out, (ref_h, ref_c) = classifier_reference(params, tokens, (h0, c0))

    assert out.shape == (batch_size,)
    assert h_n.shape == (num_layers, batch_size, hidden_dim)
    assert c_n.shape == (num_layers, batch_size, hidden_dim)
    np.testing.assert_allclose(np.asarray(out), np.asarray(ref_out), rtol=1e-4, atol=1e-4)
    np.testing.assert_allclose(np.asarray(h_n), np.asarray(ref_h), rtol=1e-4, atol=1e-4)
    np.testing.assert_allclose(np.asarray(c_n), np.asarray(ref_c), rtol=1e-4, atol=1e-4)

    # bf16 MXU-operand / bf16 gx path (fast path on v5e/v6e/v7x):
    # f32 accumulation + f32 gate/cell math.
    out_bf, (h_bf, c_bf) = classifier_forward(params, tokens, (h0, c0),
                                              compute_dtype=jnp.bfloat16)
    out_bf = jax.block_until_ready(out_bf)
    np.testing.assert_allclose(np.asarray(out_bf), np.asarray(ref_out), rtol=5e-2, atol=5e-2)
    np.testing.assert_allclose(np.asarray(h_bf), np.asarray(ref_h), rtol=5e-2, atol=5e-2)

    print("KERNEL_OK")
</pallas_src>

<mosaic_0001>
module attributes {stable_mosaic.version = 11 : i64} {
  func.func @_classifier_kernel(%arg0: memref<64x128xf32, #tpu.memory_space<vmem>>, %arg1: memref<1x32x128xf32, #tpu.memory_space<vmem>>, %arg2: memref<2x32x128xf32, #tpu.memory_space<vmem>>, %arg3: memref<2x1x128xf32, #tpu.memory_space<vmem>>, %arg4: memref<2x8x32xf32, #tpu.memory_space<vmem>>, %arg5: memref<2x8x32xf32, #tpu.memory_space<vmem>>, %arg6: memref<32x1xf32, #tpu.memory_space<vmem>>, %arg7: memref<1x1xf32, #tpu.memory_space<vmem>>, %arg8: memref<8x1xf32, #tpu.memory_space<vmem>>, %arg9: memref<2x8x32xf32, #tpu.memory_space<vmem>>, %arg10: memref<2x8x32xf32, #tpu.memory_space<vmem>>, %arg11: memref<64x32xf32, #tpu.memory_space<vmem>>, %arg12: memref<64x128xf32, #tpu.memory_space<vmem>>) attributes {dimension_semantics = [], scalar_prefetch = 0 : i64, scratch_operands = 2 : i64, tpu.core_type = #tpu.core_type<tc>} {
    %c0 = arith.constant 0 : index
    %c0_0 = arith.constant 0 : index
    %c0_1 = arith.constant 0 : index
    %0 = vector.load %arg2[%c0, %c0_0, %c0_1] : memref<2x32x128xf32, #tpu.memory_space<vmem>>, vector<1x32x128xf32>
    %1 = vector.shape_cast %0 : vector<1x32x128xf32> to vector<32x128xf32>
    %c0_2 = arith.constant 0 : index
    %c0_3 = arith.constant 0 : index
    %c0_4 = arith.constant 0 : index
    %2 = vector.load %arg4[%c0_2, %c0_3, %c0_4] : memref<2x8x32xf32, #tpu.memory_space<vmem>>, vector<1x8x32xf32>
    %3 = vector.shape_cast %2 : vector<1x8x32xf32> to vector<8x32xf32>
    %c0_5 = arith.constant 0 : index
    %c0_6 = arith.constant 0 : index
    %c0_7 = arith.constant 0 : index
    %4 = vector.load %arg5[%c0_5, %c0_6, %c0_7] : memref<2x8x32xf32, #tpu.memory_space<vmem>>, vector<1x8x32xf32>
    %5 = vector.shape_cast %4 : vector<1x8x32xf32> to vector<8x32xf32>
    %c0_i32 = arith.constant 0 : i32
    %c8_i32 = arith.constant 8 : i32
    %6 = arith.muli %c0_i32, %c8_i32 : i32
    %7 = tpu.assume_multiple %6, 8 : i32
    %8 = arith.index_cast %7 : i32 to index
    %c0_8 = arith.constant 0 : index
    %9 = vector.load %arg0[%8, %c0_8] : memref<64x128xf32, #tpu.memory_space<vmem>>, vector<8x128xf32>
    %cst = arith.constant dense<0.000000e+00> : vector<8x128xf32>
    %10 = tpu.matmul %3, %1, %cst {dimension_numbers = #tpu.dot_dimension_numbers<[1], [0], [0], [1], [0, 0, 1, 1], [], []>} : vector<8x32xf32>, vector<32x128xf32>, vector<8x128xf32> -> vector<8x128xf32>
    %11 = arith.addf %9, %10 : vector<8x128xf32>
    %12 = vector.extract_strided_slice %11 {offsets = [0, 0], sizes = [8, 96], strides = [1, 1]} : vector<8x128xf32> to vector<8x96xf32>
    %cst_9 = arith.constant 5.000000e-01 : f32
    %13 = vector.broadcast %cst_9 : f32 to vector<8x96xf32>
    %14 = arith.mulf %13, %12 : vector<8x96xf32>
    %15 = math.tanh %14 : vector<8x96xf32>
    %cst_10 = arith.constant 5.000000e-01 : f32
    %16 = vector.broadcast %cst_10 : f32 to vector<8x96xf32>
    %17 = arith.mulf %16, %15 : vector<8x96xf32>
    %cst_11 = arith.constant 5.000000e-01 : f32
    %18 = vector.broadcast %cst_11 : f32 to vector<8x96xf32>
    %19 = arith.addf %17, %18 : vector<8x96xf32>
    %20 = vector.extract_strided_slice %19 {offsets = [0, 0], sizes = [8, 32], strides = [1, 1]} : vector<8x96xf32> to vector<8x32xf32>
    %21 = vector.extract_strided_slice %19 {offsets = [0, 32], sizes = [8, 32], strides = [1, 1]} : vector<8x96xf32> to vector<8x32xf32>
    %22 = vector.extract_strided_slice %19 {offsets = [0, 64], sizes = [8, 32], strides = [1, 1]} : vector<8x96xf32> to vector<8x32xf32>
    %23 = vector.extract_strided_slice %11 {offsets = [0, 96], sizes = [8, 32], strides = [1, 1]} : vector<8x128xf32> to vector<8x32xf32>
    %24 = math.tanh %23 : vector<8x32xf32>
    %25 = arith.mulf %21, %5 : vector<8x32xf32>
    %26 = arith.mulf %20, %24 : vector<8x32xf32>
    %27 = arith.addf %25, %26 : vector<8x32xf32>
    %28 = math.tanh %27 : vector<8x32xf32>
    %29 = arith.mulf %22, %28 : vector<8x32xf32>
    %30 = arith.index_cast %7 : i32 to index
    %c0_12 = arith.constant 0 : index
    %31 = vector.load %arg11[%30, %c0_12] : memref<64x32xf32, #tpu.memory_space<vmem>>, vector<8x32xf32>
    tpu.vector_store %arg11[%30, %c0_12], %29 {strides = array<i32>} : memref<64x32xf32, #tpu.memory_space<vmem>>, vector<8x32xf32>,
    %c1_i32 = arith.constant 1 : i32
    %c8_i32_13 = arith.constant 8 : i32
    %32 = arith.muli %c1_i32, %c8_i32_13 : i32
    %33 = tpu.assume_multiple %32, 8 : i32
    %34 = arith.index_cast %33 : i32 to index
    %c0_14 = arith.constant 0 : index
    %35 = vector.load %arg0[%34, %c0_14] : memref<64x128xf32, #tpu.memory_space<vmem>>, vector<8x128xf32>
    %cst_15 = arith.constant dense<0.000000e+00> : vector<8x128xf32>
    %36 = tpu.matmul %29, %1, %cst_15 {dimension_numbers = #tpu.dot_dimension_numbers<[1], [0], [0], [1], [0, 0, 1, 1], [], []>} : vector<8x32xf32>, vector<32x128xf32>, vector<8x128xf32> -> vector<8x128xf32>
    %37 = arith.addf %35, %36 : vector<8x128xf32>
    %38 = vector.extract_strided_slice %37 {offsets = [0, 0], sizes = [8, 96], strides = [1, 1]} : vector<8x128xf32> to vector<8x96xf32>
    %cst_16 = arith.constant 5.000000e-01 : f32
    %39 = vector.broadcast %cst_16 : f32 to vector<8x96xf32>
    %40 = arith.mulf %39, %38 : vector<8x96xf32>
    %41 = math.tanh %40 : vector<8x96xf32>
    %cst_17 = arith.constant 5.000000e-01 : f32
    %42 = vector.broadcast %cst_17 : f32 to vector<8x96xf32>
    %43 = arith.mulf %42, %41 : vector<8x96xf32>
    %cst_18 = arith.constant 5.000000e-01 : f32
    %44 = vector.broadcast %cst_18 : f32 to vector<8x96xf32>
    %45 = arith.addf %43, %44 : vector<8x96xf32>
    %46 = vector.extract_strided_slice %45 {offsets = [0, 0], sizes = [8, 32], strides = [1, 1]} : vector<8x96xf32> to vector<8x32xf32>
    %47 = vector.extract_strided_slice %45 {offsets = [0, 32], sizes = [8, 32], strides = [1, 1]} : vector<8x96xf32> to vector<8x32xf32>
    %48 = vector.extract_strided_slice %45 {offsets = [0, 64], sizes = [8, 32], strides = [1, 1]} : vector<8x96xf32> to vector<8x32xf32>
    %49 = vector.extract_strided_slice %37 {offsets = [0, 96], sizes = [8, 32], strides = [1, 1]} : vector<8x128xf32> to vector<8x32xf32>
    %50 = math.tanh %49 : vector<8x32xf32>
    %51 = arith.mulf %47, %27 : vector<8x32xf32>
    %52 = arith.mulf %46, %50 : vector<8x32xf32>
    %53 = arith.addf %51, %52 : vector<8x32xf32>
    %54 = math.tanh %53 : vector<8x32xf32>
    %55 = arith.mulf %48, %54 : vector<8x32xf32>
    %56 = arith.index_cast %33 : i32 to index
    %c0_19 = arith.constant 0 : index
    %57 = vector.load %arg11[%56, %c0_19] : memref<64x32xf32, #tpu.memory_space<vmem>>, vector<8x32xf32>
    tpu.vector_store %arg11[%56, %c0_19], %55 {strides = array<i32>} : memref<64x32xf32, #tpu.memory_space<vmem>>, vector<8x32xf32>,
    %c2_i32 = arith.constant 2 : i32
    %c8_i32_20 = arith.constant 8 : i32
    %58 = arith.muli %c2_i32, %c8_i32_20 : i32
    %59 = tpu.assume_multiple %58, 8 : i32
    %60 = arith.index_cast %59 : i32 to index
    %c0_21 = arith.constant 0 : index
    %61 = vector.load %arg0[%60, %c0_21] : memref<64x128xf32, #tpu.memory_space<vmem>>, vector<8x128xf32>
    %cst_22 = arith.constant dense<0.000000e+00> : vector<8x128xf32>
    %62 = tpu.matmul %55, %1, %cst_22 {dimension_numbers = #tpu.dot_dimension_numbers<[1], [0], [0], [1], [0, 0, 1, 1], [], []>} : vector<8x32xf32>, vector<32x128xf32>, vector<8x128xf32> -> vector<8x128xf32>
    %63 = arith.addf %61, %62 : vector<8x128xf32>
    %64 = vector.extract_strided_slice %63 {offsets = [0, 0], sizes = [8, 96], strides = [1, 1]} : vector<8x128xf32> to vector<8x96xf32>
    %cst_23 = arith.constant 5.000000e-01 : f32
    %65 = vector.broadcast %cst_23 : f32 to vector<8x96xf32>
    %66 = arith.mulf %65, %64 : vector<8x96xf32>
    %67 = math.tanh %66 : vector<8x96xf32>
    %cst_24 = arith.constant 5.000000e-01 : f32
    %68 = vector.broadcast %cst_24 : f32 to vector<8x96xf32>
    %69 = arith.mulf %68, %67 : vector<8x96xf32>
    %cst_25 = arith.constant 5.000000e-01 : f32
    %70 = vector.broadcast %cst_25 : f32 to vector<8x96xf32>
    %71 = arith.addf %69, %70 : vector<8x96xf32>
    %72 = vector.extract_strided_slice %71 {offsets = [0, 0], sizes = [8, 32], strides = [1, 1]} : vector<8x96xf32> to vector<8x32xf32>
    %73 = vector.extract_strided_slice %71 {offsets = [0, 32], sizes = [8, 32], strides = [1, 1]} : vector<8x96xf32> to vector<8x32xf32>
    %74 = vector.extract_strided_slice %71 {offsets = [0, 64], sizes = [8, 32], strides = [1, 1]} : vector<8x96xf32> to vector<8x32xf32>
    %75 = vector.extract_strided_slice %63 {offsets = [0, 96], sizes = [8, 32], strides = [1, 1]} : vector<8x128xf32> to vector<8x32xf32>
    %76 = math.tanh %75 : vector<8x32xf32>
    %77 = arith.mulf %73, %53 : vector<8x32xf32>
    %78 = arith.mulf %72, %76 : vector<8x32xf32>
    %79 = arith.addf %77, %78 : vector<8x32xf32>
    %80 = math.tanh %79 : vector<8x32xf32>
    %81 = arith.mulf %74, %80 : vector<8x32xf32>
    %82 = arith.index_cast %59 : i32 to index
    %c0_26 = arith.constant 0 : index
    %83 = vector.load %arg11[%82, %c0_26] : memref<64x32xf32, #tpu.memory_space<vmem>>, vector<8x32xf32>
    tpu.vector_store %arg11[%82, %c0_26], %81 {strides = array<i32>} : memref<64x32xf32, #tpu.memory_space<vmem>>, vector<8x32xf32>,
    %c3_i32 = arith.constant 3 : i32
    %c8_i32_27 = arith.constant 8 : i32
    %84 = arith.muli %c3_i32, %c8_i32_27 : i32
    %85 = tpu.assume_multiple %84, 8 : i32
    %86 = arith.index_cast %85 : i32 to index
    %c0_28 = arith.constant 0 : index
    %87 = vector.load %arg0[%86, %c0_28] : memref<64x128xf32, #tpu.memory_space<vmem>>, vector<8x128xf32>
    %cst_29 = arith.constant dense<0.000000e+00> : vector<8x128xf32>
    %88 = tpu.matmul %81, %1, %cst_29 {dimension_numbers = #tpu.dot_dimension_numbers<[1], [0], [0], [1], [0, 0, 1, 1], [], []>} : vector<8x32xf32>, vector<32x128xf32>, vector<8x128xf32> -> vector<8x128xf32>
    %89 = arith.addf %87, %88 : vector<8x128xf32>
    %90 = vector.extract_strided_slice %89 {offsets = [0, 0], sizes = [8, 96], strides = [1, 1]} : vector<8x128xf32> to vector<8x96xf32>
    %cst_30 = arith.constant 5.000000e-01 : f32
    %91 = vector.broadcast %cst_30 : f32 to vector<8x96xf32>
    %92 = arith.mulf %91, %90 : vector<8x96xf32>
    %93 = math.tanh %92 : vector<8x96xf32>
    %cst_31 = arith.constant 5.000000e-01 : f32
    %94 = vector.broadcast %cst_31 : f32 to vector<8x96xf32>
    %95 = arith.mulf %94, %93 : vector<8x96xf32>
    %cst_32 = arith.constant 5.000000e-01 : f32
    %96 = vector.broadcast %cst_32 : f32 to vector<8x96xf32>
    %97 = arith.addf %95, %96 : vector<8x96xf32>
    %98 = vector.extract_strided_slice %97 {offsets = [0, 0], sizes = [8, 32], strides = [1, 1]} : vector<8x96xf32> to vector<8x32xf32>
    %99 = vector.extract_strided_slice %97 {offsets = [0, 32], sizes = [8, 32], strides = [1, 1]} : vector<8x96xf32> to vector<8x32xf32>
    %100 = vector.extract_strided_slice %97 {offsets = [0, 64], sizes = [8, 32], strides = [1, 1]} : vector<8x96xf32> to vector<8x32xf32>
    %101 = vector.extract_strided_slice %89 {offsets = [0, 96], sizes = [8, 32], strides = [1, 1]} : vector<8x128xf32> to vector<8x32xf32>
    %102 = math.tanh %101 : vector<8x32xf32>
    %103 = arith.mulf %99, %79 : vector<8x32xf32>
    %104 = arith.mulf %98, %102 : vector<8x32xf32>
    %105 = arith.addf %103, %104 : vector<8x32xf32>
    %106 = math.tanh %105 : vector<8x32xf32>
    %107 = arith.mulf %100, %106 : vector<8x32xf32>
    %108 = arith.index_cast %85 : i32 to index
    %c0_33 = arith.constant 0 : index
    %109 = vector.load %arg11[%108, %c0_33] : memref<64x32xf32, #tpu.memory_space<vmem>>, vector<8x32xf32>
    tpu.vector_store %arg11[%108, %c0_33], %107 {strides = array<i32>} : memref<64x32xf32, #tpu.memory_space<vmem>>, vector<8x32xf32>,
    %c4_i32 = arith.constant 4 : i32
    %c8_i32_34 = arith.constant 8 : i32
    %110 = arith.muli %c4_i32, %c8_i32_34 : i32
    %111 = tpu.assume_multiple %110, 8 : i32
    %112 = arith.index_cast %111 : i32 to index
    %c0_35 = arith.constant 0 : index
    %113 = vector.load %arg0[%112, %c0_35] : memref<64x128xf32, #tpu.memory_space<vmem>>, vector<8x128xf32>
    %cst_36 = arith.constant dense<0.000000e+00> : vector<8x128xf32>
    %114 = tpu.matmul %107, %1, %cst_36 {dimension_numbers = #tpu.dot_dimension_numbers<[1], [0], [0], [1], [0, 0, 1, 1], [], []>} : vector<8x32xf32>, vector<32x128xf32>, vector<8x128xf32> -> vector<8x128xf32>
    %115 = arith.addf %113, %114 : vector<8x128xf32>
    %116 = vector.extract_strided_slice %115 {offsets = [0, 0], sizes = [8, 96], strides = [1, 1]} : vector<8x128xf32> to vector<8x96xf32>
    %cst_37 = arith.constant 5.000000e-01 : f32
    %117 = vector.broadcast %cst_37 : f32 to vector<8x96xf32>
    %118 = arith.mulf %117, %116 : vector<8x96xf32>
    %119 = math.tanh %118 : vector<8x96xf32>
    %cst_38 = arith.constant 5.000000e-01 : f32
    %120 = vector.broadcast %cst_38 : f32 to vector<8x96xf32>
    %121 = arith.mulf %120, %119 : vector<8x96xf32>
    %cst_39 = arith.constant 5.000000e-01 : f32
    %122 = vector.broadcast %cst_39 : f32 to vector<8x96xf32>
    %123 = arith.addf %121, %122 : vector<8x96xf32>
    %124 = vector.extract_strided_slice %123 {offsets = [0, 0], sizes = [8, 32], strides = [1, 1]} : vector<8x96xf32> to vector<8x32xf32>
    %125 = vector.extract_strided_slice %123 {offsets = [0, 32], sizes = [8, 32], strides = [1, 1]} : vector<8x96xf32> to vector<8x32xf32>
    %126 = vector.extract_strided_slice %123 {offsets = [0, 64], sizes = [8, 32], strides = [1, 1]} : vector<8x96xf32> to vector<8x32xf32>
    %127 = vector.extract_strided_slice %115 {offsets = [0, 96], sizes = [8, 32], strides = [1, 1]} : vector<8x128xf32> to vector<8x32xf32>
    %128 = math.tanh %127 : vector<8x32xf32>
    %129 = arith.mulf %125, %105 : vector<8x32xf32>
    %130 = arith.mulf %124, %128 : vector<8x32xf32>
    %131 = arith.addf %129, %130 : vector<8x32xf32>
    %132 = math.tanh %131 : vector<8x32xf32>
    %133 = arith.mulf %126, %132 : vector<8x32xf32>
    %134 = arith.index_cast %111 : i32 to index
    %c0_40 = arith.constant 0 : index
    %135 = vector.load %arg11[%134, %c0_40] : memref<64x32xf32, #tpu.memory_space<vmem>>, vector<8x32xf32>
    tpu.vector_store %arg11[%134, %c0_40], %133 {strides = array<i32>} : memref<64x32xf32, #tpu.memory_space<vmem>>, vector<8x32xf32>,
    %c5_i32 = arith.constant 5 : i32
    %c8_i32_41 = arith.constant 8 : i32
    %136 = arith.muli %c5_i32, %c8_i32_41 : i32
    %137 = tpu.assume_multiple %136, 8 : i32
    %138 = arith.index_cast %137 : i32 to index
    %c0_42 = arith.constant 0 : index
    %139 = vector.load %arg0[%138, %c0_42] : memref<64x128xf32, #tpu.memory_space<vmem>>, vector<8x128xf32>
    %cst_43 = arith.constant dense<0.000000e+00> : vector<8x128xf32>
    %140 = tpu.matmul %133, %1, %cst_43 {dimension_numbers = #tpu.dot_dimension_numbers<[1], [0], [0], [1], [0, 0, 1, 1], [], []>} : vector<8x32xf32>, vector<32x128xf32>, vector<8x128xf32> -> vector<8x128xf32>
    %141 = arith.addf %139, %140 : vector<8x128xf32>
    %142 = vector.extract_strided_slice %141 {offsets = [0, 0], sizes = [8, 96], strides = [1, 1]} : vector<8x128xf32> to vector<8x96xf32>
    %cst_44 = arith.constant 5.000000e-01 : f32
    %143 = vector.broadcast %cst_44 : f32 to vector<8x96xf32>
    %144 = arith.mulf %143, %142 : vector<8x96xf32>
    %145 = math.tanh %144 : vector<8x96xf32>
    %cst_45 = arith.constant 5.000000e-01 : f32
    %146 = vector.broadcast %cst_45 : f32 to vector<8x96xf32>
    %147 = arith.mulf %146, %145 : vector<8x96xf32>
    %cst_46 = arith.constant 5.000000e-01 : f32
    %148 = vector.broadcast %cst_46 : f32 to vector<8x96xf32>
    %149 = arith.addf %147, %148 : vector<8x96xf32>
    %150 = vector.extract_strided_slice %149 {offsets = [0, 0], sizes = [8, 32], strides = [1, 1]} : vector<8x96xf32> to vector<8x32xf32>
    %151 = vector.extract_strided_slice %149 {offsets = [0, 32], sizes = [8, 32], strides = [1, 1]} : vector<8x96xf32> to vector<8x32xf32>
    %152 = vector.extract_strided_slice %149 {offsets = [0, 64], sizes = [8, 32], strides = [1, 1]} : vector<8x96xf32> to vector<8x32xf32>
    %153 = vector.extract_strided_slice %141 {offsets = [0, 96], sizes = [8, 32], strides = [1, 1]} : vector<8x128xf32> to vector<8x32xf32>
    %154 = math.tanh %153 : vector<8x32xf32>
    %155 = arith.mulf %151, %131 : vector<8x32xf32>
    %156 = arith.mulf %150, %154 : vector<8x32xf32>
    %157 = arith.addf %155, %156 : vector<8x32xf32>
    %158 = math.tanh %157 : vector<8x32xf32>
    %159 = arith.mulf %152, %158 : vector<8x32xf32>
    %160 = arith.index_cast %137 : i32 to index
    %c0_47 = arith.constant 0 : index
    %161 = vector.load %arg11[%160, %c0_47] : memref<64x32xf32, #tpu.memory_space<vmem>>, vector<8x32xf32>
    tpu.vector_store %arg11[%160, %c0_47], %159 {strides = array<i32>} : memref<64x32xf32, #tpu.memory_space<vmem>>, vector<8x32xf32>,
    %c6_i32 = arith.constant 6 : i32
    %c8_i32_48 = arith.constant 8 : i32
    %162 = arith.muli %c6_i32, %c8_i32_48 : i32
    %163 = tpu.assume_multiple %162, 8 : i32
    %164 = arith.index_cast %163 : i32 to index
    %c0_49 = arith.constant 0 : index
    %165 = vector.load %arg0[%164, %c0_49] : memref<64x128xf32, #tpu.memory_space<vmem>>, vector<8x128xf32>
    %cst_50 = arith.constant dense<0.000000e+00> : vector<8x128xf32>
    %166 = tpu.matmul %159, %1, %cst_50 {dimension_numbers = #tpu.dot_dimension_numbers<[1], [0], [0], [1], [0, 0, 1, 1], [], []>} : vector<8x32xf32>, vector<32x128xf32>, vector<8x128xf32> -> vector<8x128xf32>
    %167 = arith.addf %165, %166 : vector<8x128xf32>
    %168 = vector.extract_strided_slice %167 {offsets = [0, 0], sizes = [8, 96], strides = [1, 1]} : vector<8x128xf32> to vector<8x96xf32>
    %cst_51 = arith.constant 5.000000e-01 : f32
    %169 = vector.broadcast %cst_51 : f32 to vector<8x96xf32>
    %170 = arith.mulf %169, %168 : vector<8x96xf32>
    %171 = math.tanh %170 : vector<8x96xf32>
    %cst_52 = arith.constant 5.000000e-01 : f32
    %172 = vector.broadcast %cst_52 : f32 to vector<8x96xf32>
    %173 = arith.mulf %172, %171 : vector<8x96xf32>
    %cst_53 = arith.constant 5.000000e-01 : f32
    %174 = vector.broadcast %cst_53 : f32 to vector<8x96xf32>
    %175 = arith.addf %173, %174 : vector<8x96xf32>
    %176 = vector.extract_strided_slice %175 {offsets = [0, 0], sizes = [8, 32], strides = [1, 1]} : vector<8x96xf32> to vector<8x32xf32>
    %177 = vector.extract_strided_slice %175 {offsets = [0, 32], sizes = [8, 32], strides = [1, 1]} : vector<8x96xf32> to vector<8x32xf32>
    %178 = vector.extract_strided_slice %175 {offsets = [0, 64], sizes = [8, 32], strides = [1, 1]} : vector<8x96xf32> to vector<8x32xf32>
    %179 = vector.extract_strided_slice %167 {offsets = [0, 96], sizes = [8, 32], strides = [1, 1]} : vector<8x128xf32> to vector<8x32xf32>
    %180 = math.tanh %179 : vector<8x32xf32>
    %181 = arith.mulf %177, %157 : vector<8x32xf32>
    %182 = arith.mulf %176, %180 : vector<8x32xf32>
    %183 = arith.addf %181, %182 : vector<8x32xf32>
    %184 = math.tanh %183 : vector<8x32xf32>
    %185 = arith.mulf %178, %184 : vector<8x32xf32>
    %186 = arith.index_cast %163 : i32 to index
    %c0_54 = arith.constant 0 : index
    %187 = vector.load %arg11[%186, %c0_54] : memref<64x32xf32, #tpu.memory_space<vmem>>, vector<8x32xf32>
    tpu.vector_store %arg11[%186, %c0_54], %185 {strides = array<i32>} : memref<64x32xf32, #tpu.memory_space<vmem>>, vector<8x32xf32>,
    %c7_i32 = arith.constant 7 : i32
    %c8_i32_55 = arith.constant 8 : i32
    %188 = arith.muli %c7_i32, %c8_i32_55 : i32
    %189 = tpu.assume_multiple %188, 8 : i32
    %190 = arith.index_cast %189 : i32 to index
    %c0_56 = arith.constant 0 : index
    %191 = vector.load %arg0[%190, %c0_56] : memref<64x128xf32, #tpu.memory_space<vmem>>, vector<8x128xf32>
    %cst_57 = arith.constant dense<0.000000e+00> : vector<8x128xf32>
    %192 = tpu.matmul %185, %1, %cst_57 {dimension_numbers = #tpu.dot_dimension_numbers<[1], [0], [0], [1], [0, 0, 1, 1], [], []>} : vector<8x32xf32>, vector<32x128xf32>, vector<8x128xf32> -> vector<8x128xf32>
    %193 = arith.addf %191, %192 : vector<8x128xf32>
    %194 = vector.extract_strided_slice %193 {offsets = [0, 0], sizes = [8, 96], strides = [1, 1]} : vector<8x128xf32> to vector<8x96xf32>
    %cst_58 = arith.constant 5.000000e-01 : f32
    %195 = vector.broadcast %cst_58 : f32 to vector<8x96xf32>
    %196 = arith.mulf %195, %194 : vector<8x96xf32>
    %197 = math.tanh %196 : vector<8x96xf32>
    %cst_59 = arith.constant 5.000000e-01 : f32
    %198 = vector.broadcast %cst_59 : f32 to vector<8x96xf32>
    %199 = arith.mulf %198, %197 : vector<8x96xf32>
    %cst_60 = arith.constant 5.000000e-01 : f32
    %200 = vector.broadcast %cst_60 : f32 to vector<8x96xf32>
    %201 = arith.addf %199, %200 : vector<8x96xf32>
    %202 = vector.extract_strided_slice %201 {offsets = [0, 0], sizes = [8, 32], strides = [1, 1]} : vector<8x96xf32> to vector<8x32xf32>
    %203 = vector.extract_strided_slice %201 {offsets = [0, 32], sizes = [8, 32], strides = [1, 1]} : vector<8x96xf32> to vector<8x32xf32>
    %204 = vector.extract_strided_slice %201 {offsets = [0, 64], sizes = [8, 32], strides = [1, 1]} : vector<8x96xf32> to vector<8x32xf32>
    %205 = vector.extract_strided_slice %193 {offsets = [0, 96], sizes = [8, 32], strides = [1, 1]} : vector<8x128xf32> to vector<8x32xf32>
    %206 = math.tanh %205 : vector<8x32xf32>
    %207 = arith.mulf %203, %183 : vector<8x32xf32>
    %208 = arith.mulf %202, %206 : vector<8x32xf32>
    %209 = arith.addf %207, %208 : vector<8x32xf32>
    %210 = math.tanh %209 : vector<8x32xf32>
    %211 = arith.mulf %204, %210 : vector<8x32xf32>
    %212 = arith.index_cast %189 : i32 to index
    %c0_61 = arith.constant 0 : index
    %213 = vector.load %arg11[%212, %c0_61] : memref<64x32xf32, #tpu.memory_space<vmem>>, vector<8x32xf32>
    tpu.vector_store %arg11[%212, %c0_61], %211 {strides = array<i32>} : memref<64x32xf32, #tpu.memory_space<vmem>>, vector<8x32xf32>,
    %c8_i32_62 = arith.constant 8 : i32
    %c0_63 = arith.constant 0 : index
    %c0_64 = arith.constant 0 : index
    %c0_65 = arith.constant 0 : index
    %214 = vector.load %arg9[%c0_63, %c0_64, %c0_65] : memref<2x8x32xf32, #tpu.memory_space<vmem>>, vector<1x8x32xf32>
    %215 = vector.shape_cast %214 : vector<1x8x32xf32> to vector<8x32xf32>
    %216 = vector.shape_cast %211 : vector<8x32xf32> to vector<1x8x32xf32>
    tpu.vector_store %arg9[%c0_63, %c0_64, %c0_65], %216 {strides = array<i32>} : memref<2x8x32xf32, #tpu.memory_space<vmem>>, vector<1x8x32xf32>,
    %c0_66 = arith.constant 0 : index
    %c0_67 = arith.constant 0 : index
    %c0_68 = arith.constant 0 : index
    %217 = vector.load %arg10[%c0_66, %c0_67, %c0_68] : memref<2x8x32xf32, #tpu.memory_space<vmem>>, vector<1x8x32xf32>
    %218 = vector.shape_cast %217 : vector<1x8x32xf32> to vector<8x32xf32>
    %219 = vector.shape_cast %209 : vector<8x32xf32> to vector<1x8x32xf32>
    tpu.vector_store %arg10[%c0_66, %c0_67, %c0_68], %219 {strides = array<i32>} : memref<2x8x32xf32, #tpu.memory_space<vmem>>, vector<1x8x32xf32>,
    %c0_69 = arith.constant 0 : index
    %c0_70 = arith.constant 0 : index
    %c0_71 = arith.constant 0 : index
    %220 = vector.load %arg1[%c0_69, %c0_70, %c0_71] : memref<1x32x128xf32, #tpu.memory_space<vmem>>, vector<1x32x128xf32>
    %221 = vector.shape_cast %220 : vector<1x32x128xf32> to vector<32x128xf32>
    %c1 = arith.constant 1 : index
    %c0_72 = arith.constant 0 : index
    %c0_73 = arith.constant 0 : index
    %222 = vector.load %arg3[%c1, %c0_72, %c0_73] : memref<2x1x128xf32, #tpu.memory_space<vmem>>, vector<1x1x128xf32>
    %223 = vector.shape_cast %222 : vector<1x1x128xf32> to vector<1x128xf32>
    %224 = vector.shape_cast %223 : vector<1x128xf32> to vector<1x128xf32>
    %225 = vector.broadcast %224 : vector<1x128xf32> to vector<64x128xf32>
    %c0_74 = arith.constant 0 : index
    %c0_75 = arith.constant 0 : index
    %226 = vector.load %arg11[%c0_74, %c0_75] : memref<64x32xf32, #tpu.memory_space<vmem>>, vector<64x32xf32>
    %cst_76 = arith.constant dense<0.000000e+00> : vector<64x128xf32>
    %227 = tpu.matmul %226, %221, %cst_76 {dimension_numbers = #tpu.dot_dimension_numbers<[1], [0], [0], [1], [0, 0, 1, 1], [], []>} : vector<64x32xf32>, vector<32x128xf32>, vector<64x128xf32> -> vector<64x128xf32>
    %228 = arith.addf %227, %225 : vector<64x128xf32>
    %c0_77 = arith.constant 0 : index
    %c0_78 = arith.constant 0 : index
    %229 = vector.load %arg12[%c0_77, %c0_78] : memref<64x128xf32, #tpu.memory_space<vmem>>, vector<64x128xf32>
    tpu.vector_store %arg12[%c0_77, %c0_78], %228 {strides = array<i32>} : memref<64x128xf32, #tpu.memory_space<vmem>>, vector<64x128xf32>,
    %c1_79 = arith.constant 1 : index
    %c0_80 = arith.constant 0 : index
    %c0_81 = arith.constant 0 : index
    %230 = vector.load %arg2[%c1_79, %c0_80, %c0_81] : memref<2x32x128xf32, #tpu.memory_space<vmem>>, vector<1x32x128xf32>
    %231 = vector.shape_cast %230 : vector<1x32x128xf32> to vector<32x128xf32>
    %c1_82 = arith.constant 1 : index
    %c0_83 = arith.constant 0 : index
    %c0_84 = arith.constant 0 : index
    %232 = vector.load %arg4[%c1_82, %c0_83, %c0_84] : memref<2x8x32xf32, #tpu.memory_space<vmem>>, vector<1x8x32xf32>
    %233 = vector.shape_cast %232 : vector<1x8x32xf32> to vector<8x32xf32>
    %c1_85 = arith.constant 1 : index
    %c0_86 = arith.constant 0 : index
    %c0_87 = arith.constant 0 : index
    %234 = vector.load %arg5[%c1_85, %c0_86, %c0_87] : memref<2x8x32xf32, #tpu.memory_space<vmem>>, vector<1x8x32xf32>
    %235 = vector.shape_cast %234 : vector<1x8x32xf32> to vector<8x32xf32>
    %c0_i32_88 = arith.constant 0 : i32
    %c8_i32_89 = arith.constant 8 : i32
    %236 = arith.muli %c0_i32_88, %c8_i32_89 : i32
    %237 = tpu.assume_multiple %236, 8 : i32
    %238 = arith.index_cast %237 : i32 to index
    %c0_90 = arith.constant 0 : index
    %239 = vector.load %arg12[%238, %c0_90] : memref<64x128xf32, #tpu.memory_space<vmem>>, vector<8x128xf32>
    %cst_91 = arith.constant dense<0.000000e+00> : vector<8x128xf32>
    %240 = tpu.matmul %233, %231, %cst_91 {dimension_numbers = #tpu.dot_dimension_numbers<[1], [0], [0], [1], [0, 0, 1, 1], [], []>} : vector<8x32xf32>, vector<32x128xf32>, vector<8x128xf32> -> vector<8x128xf32>
    %241 = arith.addf %239, %240 : vector<8x128xf32>
    %242 = vector.extract_strided_slice %241 {offsets = [0, 0], sizes = [8, 96], strides = [1, 1]} : vector<8x128xf32> to vector<8x96xf32>
    %cst_92 = arith.constant 5.000000e-01 : f32
    %243 = vector.broadcast %cst_92 : f32 to vector<8x96xf32>
    %244 = arith.mulf %243, %242 : vector<8x96xf32>
    %245 = math.tanh %244 : vector<8x96xf32>
    %cst_93 = arith.constant 5.000000e-01 : f32
    %246 = vector.broadcast %cst_93 : f32 to vector<8x96xf32>
    %247 = arith.mulf %246, %245 : vector<8x96xf32>
    %cst_94 = arith.constant 5.000000e-01 : f32
    %248 = vector.broadcast %cst_94 : f32 to vector<8x96xf32>
    %249 = arith.addf %247, %248 : vector<8x96xf32>
    %250 = vector.extract_strided_slice %249 {offsets = [0, 0], sizes = [8, 32], strides = [1, 1]} : vector<8x96xf32> to vector<8x32xf32>
    %251 = vector.extract_strided_slice %249 {offsets = [0, 32], sizes = [8, 32], strides = [1, 1]} : vector<8x96xf32> to vector<8x32xf32>
    %252 = vector.extract_strided_slice %249 {offsets = [0, 64], sizes = [8, 32], strides = [1, 1]} : vector<8x96xf32> to vector<8x32xf32>
    %253 = vector.extract_strided_slice %241 {offsets = [0, 96], sizes = [8, 32], strides = [1, 1]} : vector<8x128xf32> to vector<8x32xf32>
    %254 = math.tanh %253 : vector<8x32xf32>
    %255 = arith.mulf %251, %235 : vector<8x32xf32>
    %256 = arith.mulf %250, %254 : vector<8x32xf32>
    %257 = arith.addf %255, %256 : vector<8x32xf32>
    %258 = math.tanh %257 : vector<8x32xf32>
    %259 = arith.mulf %252, %258 : vector<8x32xf32>
    %c1_i32_95 = arith.constant 1 : i32
    %c8_i32_96 = arith.constant 8 : i32
    %260 = arith.muli %c1_i32_95, %c8_i32_96 : i32
    %261 = tpu.assume_multiple %260, 8 : i32
    %262 = arith.index_cast %261 : i32 to index
    %c0_97 = arith.constant 0 : index
    %263 = vector.load %arg12[%262, %c0_97] : memref<64x128xf32, #tpu.memory_space<vmem>>, vector<8x128xf32>
    %cst_98 = arith.constant dense<0.000000e+00> : vector<8x128xf32>
    %264 = tpu.matmul %259, %231, %cst_98 {dimension_numbers = #tpu.dot_dimension_numbers<[1], [0], [0], [1], [0, 0, 1, 1], [], []>} : vector<8x32xf32>, vector<32x128xf32>, vector<8x128xf32> -> vector<8x128xf32>
    %265 = arith.addf %263, %264 : vector<8x128xf32>
    %266 = vector.extract_strided_slice %265 {offsets = [0, 0], sizes = [8, 96], strides = [1, 1]} : vector<8x128xf32> to vector<8x96xf32>
    %cst_99 = arith.constant 5.000000e-01 : f32
    %267 = vector.broadcast %cst_99 : f32 to vector<8x96xf32>
    %268 = arith.mulf %267, %266 : vector<8x96xf32>
    %269 = math.tanh %268 : vector<8x96xf32>
    %cst_100 = arith.constant 5.000000e-01 : f32
    %270 = vector.broadcast %cst_100 : f32 to vector<8x96xf32>
    %271 = arith.mulf %270, %269 : vector<8x96xf32>
    %cst_101 = arith.constant 5.000000e-01 : f32
    %272 = vector.broadcast %cst_101 : f32 to vector<8x96xf32>
    %273 = arith.addf %271, %272 : vector<8x96xf32>
    %274 = vector.extract_strided_slice %273 {offsets = [0, 0], sizes = [8, 32], strides = [1, 1]} : vector<8x96xf32> to vector<8x32xf32>
    %275 = vector.extract_strided_slice %273 {offsets = [0, 32], sizes = [8, 32], strides = [1, 1]} : vector<8x96xf32> to vector<8x32xf32>
    %276 = vector.extract_strided_slice %273 {offsets = [0, 64], sizes = [8, 32], strides = [1, 1]} : vector<8x96xf32> to vector<8x32xf32>
    %277 = vector.extract_strided_slice %265 {offsets = [0, 96], sizes = [8, 32], strides = [1, 1]} : vector<8x128xf32> to vector<8x32xf32>
    %278 = math.tanh %277 : vector<8x32xf32>
    %279 = arith.mulf %275, %257 : vector<8x32xf32>
    %280 = arith.mulf %274, %278 : vector<8x32xf32>
    %281 = arith.addf %279, %280 : vector<8x32xf32>
    %282 = math.tanh %281 : vector<8x32xf32>
    %283 = arith.mulf %276, %282 : vector<8x32xf32>
    %c2_i32_102 = arith.constant 2 : i32
    %c8_i32_103 = arith.constant 8 : i32
    %284 = arith.muli %c2_i32_102, %c8_i32_103 : i32
    %285 = tpu.assume_multiple %284, 8 : i32
    %286 = arith.index_cast %285 : i32 to index
    %c0_104 = arith.constant 0 : index
    %287 = vector.load %arg12[%286, %c0_104] : memref<64x128xf32, #tpu.memory_space<vmem>>, vector<8x128xf32>
    %cst_105 = arith.constant dense<0.000000e+00> : vector<8x128xf32>
    %288 = tpu.matmul %283, %231, %cst_105 {dimension_numbers = #tpu.dot_dimension_numbers<[1], [0], [0], [1], [0, 0, 1, 1], [], []>} : vector<8x32xf32>, vector<32x128xf32>, vector<8x128xf32> -> vector<8x128xf32>
    %289 = arith.addf %287, %288 : vector<8x128xf32>
    %290 = vector.extract_strided_slice %289 {offsets = [0, 0], sizes = [8, 96], strides = [1, 1]} : vector<8x128xf32> to vector<8x96xf32>
    %cst_106 = arith.constant 5.000000e-01 : f32
    %291 = vector.broadcast %cst_106 : f32 to vector<8x96xf32>
    %292 = arith.mulf %291, %290 : vector<8x96xf32>
    %293 = math.tanh %292 : vector<8x96xf32>
    %cst_107 = arith.constant 5.000000e-01 : f32
    %294 = vector.broadcast %cst_107 : f32 to vector<8x96xf32>
    %295 = arith.mulf %294, %293 : vector<8x96xf32>
    %cst_108 = arith.constant 5.000000e-01 : f32
    %296 = vector.broadcast %cst_108 : f32 to vector<8x96xf32>
    %297 = arith.addf %295, %296 : vector<8x96xf32>
    %298 = vector.extract_strided_slice %297 {offsets = [0, 0], sizes = [8, 32], strides = [1, 1]} : vector<8x96xf32> to vector<8x32xf32>
    %299 = vector.extract_strided_slice %297 {offsets = [0, 32], sizes = [8, 32], strides = [1, 1]} : vector<8x96xf32> to vector<8x32xf32>
    %300 = vector.extract_strided_slice %297 {offsets = [0, 64], sizes = [8, 32], strides = [1, 1]} : vector<8x96xf32> to vector<8x32xf32>
    %301 = vector.extract_strided_slice %289 {offsets = [0, 96], sizes = [8, 32], strides = [1, 1]} : vector<8x128xf32> to vector<8x32xf32>
    %302 = math.tanh %301 : vector<8x32xf32>
    %303 = arith.mulf %299, %281 : vector<8x32xf32>
    %304 = arith.mulf %298, %302 : vector<8x32xf32>
    %305 = arith.addf %303, %304 : vector<8x32xf32>
    %306 = math.tanh %305 : vector<8x32xf32>
    %307 = arith.mulf %300, %306 : vector<8x32xf32>
    %c3_i32_109 = arith.constant 3 : i32
    %c8_i32_110 = arith.constant 8 : i32
    %308 = arith.muli %c3_i32_109, %c8_i32_110 : i32
    %309 = tpu.assume_multiple %308, 8 : i32
    %310 = arith.index_cast %309 : i32 to index
    %c0_111 = arith.constant 0 : index
    %311 = vector.load %arg12[%310, %c0_111] : memref<64x128xf32, #tpu.memory_space<vmem>>, vector<8x128xf32>
    %cst_112 = arith.constant dense<0.000000e+00> : vector<8x128xf32>
    %312 = tpu.matmul %307, %231, %cst_112 {dimension_numbers = #tpu.dot_dimension_numbers<[1], [0], [0], [1], [0, 0, 1, 1], [], []>} : vector<8x32xf32>, vector<32x128xf32>, vector<8x128xf32> -> vector<8x128xf32>
    %313 = arith.addf %311, %312 : vector<8x128xf32>
    %314 = vector.extract_strided_slice %313 {offsets = [0, 0], sizes = [8, 96], strides = [1, 1]} : vector<8x128xf32> to vector<8x96xf32>
    %cst_113 = arith.constant 5.000000e-01 : f32
    %315 = vector.broadcast %cst_113 : f32 to vector<8x96xf32>
    %316 = arith.mulf %315, %314 : vector<8x96xf32>
    %317 = math.tanh %316 : vector<8x96xf32>
    %cst_114 = arith.constant 5.000000e-01 : f32
    %318 = vector.broadcast %cst_114 : f32 to vector<8x96xf32>
    %319 = arith.mulf %318, %317 : vector<8x96xf32>
    %cst_115 = arith.constant 5.000000e-01 : f32
    %320 = vector.broadcast %cst_115 : f32 to vector<8x96xf32>
    %321 = arith.addf %319, %320 : vector<8x96xf32>
    %322 = vector.extract_strided_slice %321 {offsets = [0, 0], sizes = [8, 32], strides = [1, 1]} : vector<8x96xf32> to vector<8x32xf32>
    %323 = vector.extract_strided_slice %321 {offsets = [0, 32], sizes = [8, 32], strides = [1, 1]} : vector<8x96xf32> to vector<8x32xf32>
    %324 = vector.extract_strided_slice %321 {offsets = [0, 64], sizes = [8, 32], strides = [1, 1]} : vector<8x96xf32> to vector<8x32xf32>
    %325 = vector.extract_strided_slice %313 {offsets = [0, 96], sizes = [8, 32], strides = [1, 1]} : vector<8x128xf32> to vector<8x32xf32>
    %326 = math.tanh %325 : vector<8x32xf32>
    %327 = arith.mulf %323, %305 : vector<8x32xf32>
    %328 = arith.mulf %322, %326 : vector<8x32xf32>
    %329 = arith.addf %327, %328 : vector<8x32xf32>
    %330 = math.tanh %329 : vector<8x32xf32>
    %331 = arith.mulf %324, %330 : vector<8x32xf32>
    %c4_i32_116 = arith.constant 4 : i32
    %c8_i32_117 = arith.constant 8 : i32
    %332 = arith.muli %c4_i32_116, %c8_i32_117 : i32
    %333 = tpu.assume_multiple %332, 8 : i32
    %334 = arith.index_cast %333 : i32 to index
    %c0_118 = arith.constant 0 : index
    %335 = vector.load %arg12[%334, %c0_118] : memref<64x128xf32, #tpu.memory_space<vmem>>, vector<8x128xf32>
    %cst_119 = arith.constant dense<0.000000e+00> : vector<8x128xf32>
    %336 = tpu.matmul %331, %231, %cst_119 {dimension_numbers = #tpu.dot_dimension_numbers<[1], [0], [0], [1], [0, 0, 1, 1], [], []>} : vector<8x32xf32>, vector<32x128xf32>, vector<8x128xf32> -> vector<8x128xf32>
    %337 = arith.addf %335, %336 : vector<8x128xf32>
    %338 = vector.extract_strided_slice %337 {offsets = [0, 0], sizes = [8, 96], strides = [1, 1]} : vector<8x128xf32> to vector<8x96xf32>
    %cst_120 = arith.constant 5.000000e-01 : f32
    %339 = vector.broadcast %cst_120 : f32 to vector<8x96xf32>
    %340 = arith.mulf %339, %338 : vector<8x96xf32>
    %341 = math.tanh %340 : vector<8x96xf32>
    %cst_121 = arith.constant 5.000000e-01 : f32
    %342 = vector.broadcast %cst_121 : f32 to vector<8x96xf32>
    %343 = arith.mulf %342, %341 : vector<8x96xf32>
    %cst_122 = arith.constant 5.000000e-01 : f32
    %344 = vector.broadcast %cst_122 : f32 to vector<8x96xf32>
    %345 = arith.addf %343, %344 : vector<8x96xf32>
    %346 = vector.extract_strided_slice %345 {offsets = [0, 0], sizes = [8, 32], strides = [1, 1]} : vector<8x96xf32> to vector<8x32xf32>
    %347 = vector.extract_strided_slice %345 {offsets = [0, 32], sizes = [8, 32], strides = [1, 1]} : vector<8x96xf32> to vector<8x32xf32>
    %348 = vector.extract_strided_slice %345 {offsets = [0, 64], sizes = [8, 32], strides = [1, 1]} : vector<8x96xf32> to vector<8x32xf32>
    %349 = vector.extract_strided_slice %337 {offsets = [0, 96], sizes = [8, 32], strides = [1, 1]} : vector<8x128xf32> to vector<8x32xf32>
    %350 = math.tanh %349 : vector<8x32xf32>
    %351 = arith.mulf %347, %329 : vector<8x32xf32>
    %352 = arith.mulf %346, %350 : vector<8x32xf32>
    %353 = arith.addf %351, %352 : vector<8x32xf32>
    %354 = math.tanh %353 : vector<8x32xf32>
    %355 = arith.mulf %348, %354 : vector<8x32xf32>
    %c5_i32_123 = arith.constant 5 : i32
    %c8_i32_124 = arith.constant 8 : i32
    %356 = arith.muli %c5_i32_123, %c8_i32_124 : i32
    %357 = tpu.assume_multiple %356, 8 : i32
    %358 = arith.index_cast %357 : i32 to index
    %c0_125 = arith.constant 0 : index
    %359 = vector.load %arg12[%358, %c0_125] : memref<64x128xf32, #tpu.memory_space<vmem>>, vector<8x128xf32>
    %cst_126 = arith.constant dense<0.000000e+00> : vector<8x128xf32>
    %360 = tpu.matmul %355, %231, %cst_126 {dimension_numbers = #tpu.dot_dimension_numbers<[1], [0], [0], [1], [0, 0, 1, 1], [], []>} : vector<8x32xf32>, vector<32x128xf32>, vector<8x128xf32> -> vector<8x128xf32>
    %361 = arith.addf %359, %360 : vector<8x128xf32>
    %362 = vector.extract_strided_slice %361 {offsets = [0, 0], sizes = [8, 96], strides = [1, 1]} : vector<8x128xf32> to vector<8x96xf32>
    %cst_127 = arith.constant 5.000000e-01 : f32
    %363 = vector.broadcast %cst_127 : f32 to vector<8x96xf32>
    %364 = arith.mulf %363, %362 : vector<8x96xf32>
    %365 = math.tanh %364 : vector<8x96xf32>
    %cst_128 = arith.constant 5.000000e-01 : f32
    %366 = vector.broadcast %cst_128 : f32 to vector<8x96xf32>
    %367 = arith.mulf %366, %365 : vector<8x96xf32>
    %cst_129 = arith.constant 5.000000e-01 : f32
    %368 = vector.broadcast %cst_129 : f32 to vector<8x96xf32>
    %369 = arith.addf %367, %368 : vector<8x96xf32>
    %370 = vector.extract_strided_slice %369 {offsets = [0, 0], sizes = [8, 32], strides = [1, 1]} : vector<8x96xf32> to vector<8x32xf32>
    %371 = vector.extract_strided_slice %369 {offsets = [0, 32], sizes = [8, 32], strides = [1, 1]} : vector<8x96xf32> to vector<8x32xf32>
    %372 = vector.extract_strided_slice %369 {offsets = [0, 64], sizes = [8, 32], strides = [1, 1]} : vector<8x96xf32> to vector<8x32xf32>
    %373 = vector.extract_strided_slice %361 {offsets = [0, 96], sizes = [8, 32], strides = [1, 1]} : vector<8x128xf32> to vector<8x32xf32>
    %374 = math.tanh %373 : vector<8x32xf32>
    %375 = arith.mulf %371, %353 : vector<8x32xf32>
    %376 = arith.mulf %370, %374 : vector<8x32xf32>
    %377 = arith.addf %375, %376 : vector<8x32xf32>
    %378 = math.tanh %377 : vector<8x32xf32>
    %379 = arith.mulf %372, %378 : vector<8x32xf32>
    %c6_i32_130 = arith.constant 6 : i32
    %c8_i32_131 = arith.constant 8 : i32
    %380 = arith.muli %c6_i32_130, %c8_i32_131 : i32
    %381 = tpu.assume_multiple %380, 8 : i32
    %382 = arith.index_cast %381 : i32 to index
    %c0_132 = arith.constant 0 : index
    %383 = vector.load %arg12[%382, %c0_132] : memref<64x128xf32, #tpu.memory_space<vmem>>, vector<8x128xf32>
    %cst_133 = arith.constant dense<0.000000e+00> : vector<8x128xf32>
    %384 = tpu.matmul %379, %231, %cst_133 {dimension_numbers = #tpu.dot_dimension_numbers<[1], [0], [0], [1], [0, 0, 1, 1], [], []>} : vector<8x32xf32>, vector<32x128xf32>, vector<8x128xf32> -> vector<8x128xf32>
    %385 = arith.addf %383, %384 : vector<8x128xf32>
    %386 = vector.extract_strided_slice %385 {offsets = [0, 0], sizes = [8, 96], strides = [1, 1]} : vector<8x128xf32> to vector<8x96xf32>
    %cst_134 = arith.constant 5.000000e-01 : f32
    %387 = vector.broadcast %cst_134 : f32 to vector<8x96xf32>
    %388 = arith.mulf %387, %386 : vector<8x96xf32>
    %389 = math.tanh %388 : vector<8x96xf32>
    %cst_135 = arith.constant 5.000000e-01 : f32
    %390 = vector.broadcast %cst_135 : f32 to vector<8x96xf32>
    %391 = arith.mulf %390, %389 : vector<8x96xf32>
    %cst_136 = arith.constant 5.000000e-01 : f32
    %392 = vector.broadcast %cst_136 : f32 to vector<8x96xf32>
    %393 = arith.addf %391, %392 : vector<8x96xf32>
    %394 = vector.extract_strided_slice %393 {offsets = [0, 0], sizes = [8, 32], strides = [1, 1]} : vector<8x96xf32> to vector<8x32xf32>
    %395 = vector.extract_strided_slice %393 {offsets = [0, 32], sizes = [8, 32], strides = [1, 1]} : vector<8x96xf32> to vector<8x32xf32>
    %396 = vector.extract_strided_slice %393 {offsets = [0, 64], sizes = [8, 32], strides = [1, 1]} : vector<8x96xf32> to vector<8x32xf32>
    %397 = vector.extract_strided_slice %385 {offsets = [0, 96], sizes = [8, 32], strides = [1, 1]} : vector<8x128xf32> to vector<8x32xf32>
    %398 = math.tanh %397 : vector<8x32xf32>
    %399 = arith.mulf %395, %377 : vector<8x32xf32>
    %400 = arith.mulf %394, %398 : vector<8x32xf32>
    %401 = arith.addf %399, %400 : vector<8x32xf32>
    %402 = math.tanh %401 : vector<8x32xf32>
    %403 = arith.mulf %396, %402 : vector<8x32xf32>
    %c7_i32_137 = arith.constant 7 : i32
    %c8_i32_138 = arith.constant 8 : i32
    %404 = arith.muli %c7_i32_137, %c8_i32_138 : i32
    %405 = tpu.assume_multiple %404, 8 : i32
    %406 = arith.index_cast %405 : i32 to index
    %c0_139 = arith.constant 0 : index
    %407 = vector.load %arg12[%406, %c0_139] : memref<64x128xf32, #tpu.memory_space<vmem>>, vector<8x128xf32>
    %cst_140 = arith.constant dense<0.000000e+00> : vector<8x128xf32>
    %408 = tpu.matmul %403, %231, %cst_140 {dimension_numbers = #tpu.dot_dimension_numbers<[1], [0], [0], [1], [0, 0, 1, 1], [], []>} : vector<8x32xf32>, vector<32x128xf32>, vector<8x128xf32> -> vector<8x128xf32>
    %409 = arith.addf %407, %408 : vector<8x128xf32>
    %410 = vector.extract_strided_slice %409 {offsets = [0, 0], sizes = [8, 96], strides = [1, 1]} : vector<8x128xf32> to vector<8x96xf32>
    %cst_141 = arith.constant 5.000000e-01 : f32
    %411 = vector.broadcast %cst_141 : f32 to vector<8x96xf32>
    %412 = arith.mulf %411, %410 : vector<8x96xf32>
    %413 = math.tanh %412 : vector<8x96xf32>
    %cst_142 = arith.constant 5.000000e-01 : f32
    %414 = vector.broadcast %cst_142 : f32 to vector<8x96xf32>
    %415 = arith.mulf %414, %413 : vector<8x96xf32>
    %cst_143 = arith.constant 5.000000e-01 : f32
    %416 = vector.broadcast %cst_143 : f32 to vector<8x96xf32>
    %417 = arith.addf %415, %416 : vector<8x96xf32>
    %418 = vector.extract_strided_slice %417 {offsets = [0, 0], sizes = [8, 32], strides = [1, 1]} : vector<8x96xf32> to vector<8x32xf32>
    %419 = vector.extract_strided_slice %417 {offsets = [0, 32], sizes = [8, 32], strides = [1, 1]} : vector<8x96xf32> to vector<8x32xf32>
    %420 = vector.extract_strided_slice %417 {offsets = [0, 64], sizes = [8, 32], strides = [1, 1]} : vector<8x96xf32> to vector<8x32xf32>
    %421 = vector.extract_strided_slice %409 {offsets = [0, 96], sizes = [8, 32], strides = [1, 1]} : vector<8x128xf32> to vector<8x32xf32>
    %422 = math.tanh %421 : vector<8x32xf32>
    %423 = arith.mulf %419, %401 : vector<8x32xf32>
    %424 = arith.mulf %418, %422 : vector<8x32xf32>
    %425 = arith.addf %423, %424 : vector<8x32xf32>
    %426 = math.tanh %425 : vector<8x32xf32>
    %427 = arith.mulf %420, %426 : vector<8x32xf32>
    %c8_i32_144 = arith.constant 8 : i32
    %c1_145 = arith.constant 1 : index
    %c0_146 = arith.constant 0 : index
    %c0_147 = arith.constant 0 : index
    %428 = vector.load %arg9[%c1_145, %c0_146, %c0_147] : memref<2x8x32xf32, #tpu.memory_space<vmem>>, vector<1x8x32xf32>
    %429 = vector.shape_cast %428 : vector<1x8x32xf32> to vector<8x32xf32>
    %430 = vector.shape_cast %427 : vector<8x32xf32> to vector<1x8x32xf32>
    tpu.vector_store %arg9[%c1_145, %c0_146, %c0_147], %430 {strides = array<i32>} : memref<2x8x32xf32, #tpu.memory_space<vmem>>, vector<1x8x32xf32>,
    %c1_148 = arith.constant 1 : index
    %c0_149 = arith.constant 0 : index
    %c0_150 = arith.constant 0 : index
    %431 = vector.load %arg10[%c1_148, %c0_149, %c0_150] : memref<2x8x32xf32, #tpu.memory_space<vmem>>, vector<1x8x32xf32>
    %432 = vector.shape_cast %431 : vector<1x8x32xf32> to vector<8x32xf32>
    %433 = vector.shape_cast %425 : vector<8x32xf32> to vector<1x8x32xf32>
    tpu.vector_store %arg10[%c1_148, %c0_149, %c0_150], %433 {strides = array<i32>} : memref<2x8x32xf32, #tpu.memory_space<vmem>>, vector<1x8x32xf32>,
    %c0_151 = arith.constant 0 : index
    %c0_152 = arith.constant 0 : index
    %434 = vector.load %arg6[%c0_151, %c0_152] : memref<32x1xf32, #tpu.memory_space<vmem>>, vector<32x1xf32>
    %cst_153 = arith.constant dense<0.000000e+00> : vector<8x1xf32>
    %435 = tpu.matmul %427, %434, %cst_153 {dimension_numbers = #tpu.dot_dimension_numbers<[1], [0], [0], [1], [0, 0, 1, 1], [], []>} : vector<8x32xf32>, vector<32x1xf32>, vector<8x1xf32> -> vector<8x1xf32>
    %c0_154 = arith.constant 0 : index
    %c0_155 = arith.constant 0 : index
    %436 = vector.load %arg7[%c0_154, %c0_155] : memref<1x1xf32, #tpu.memory_space<vmem>>, vector<1x1xf32>
    %437 = vector.broadcast %436 : vector<1x1xf32> to vector<8x1xf32>
    %438 = arith.addf %435, %437 : vector<8x1xf32>
    %cst_156 = arith.constant 5.000000e-01 : f32
    %439 = vector.broadcast %cst_156 : f32 to vector<8x1xf32>
    %440 = arith.mulf %439, %438 : vector<8x1xf32>
    %441 = math.tanh %440 : vector<8x1xf32>
    %cst_157 = arith.constant 5.000000e-01 : f32
    %442 = vector.broadcast %cst_157 : f32 to vector<8x1xf32>
    %443 = arith.mulf %442, %441 : vector<8x1xf32>
    %cst_158 = arith.constant 5.000000e-01 : f32
    %444 = vector.broadcast %cst_158 : f32 to vector<8x1xf32>
    %445 = arith.addf %443, %444 : vector<8x1xf32>
    %c0_159 = arith.constant 0 : index
    %c0_160 = arith.constant 0 : index
    %446 = vector.load %arg8[%c0_159, %c0_160] : memref<8x1xf32, #tpu.memory_space<vmem>>, vector<8x1xf32>
    tpu.vector_store %arg8[%c0_159, %c0_160], %445 {strides = array<i32>} : memref<8x1xf32, #tpu.memory_space<vmem>>, vector<8x1xf32>,
    return
  }
}

</mosaic_0001>

<bundles_post_ra>
// kernel: tpu_custom_call.1
= control target key start
LH: loop header
LB: loop body
LE: loop exit
PB: predicated region body
PF: predicated region fallthrough
CT: control target
= control target key end

     0   :  { %s3194_s0 = inlined_call_operand.hbm [shape: f32[64,128], index: 0, kind: input, shape index: {}]   ;;  %s3195_s1 = inlined_call_operand.vmem [shape: f32[1,32,128], index: 1, kind: input, shape index: {}]   ;;  %s3196_s2 = inlined_call_operand.hbm [shape: f32[2,32,128], index: 2, kind: input, shape index: {}]   ;;  %s3197_s3 = inlined_call_operand.hbm [shape: f32[2,1,128], index: 3, kind: input, shape index: {}]   ;;  %s3198_s4 = inlined_call_operand.vmem [shape: f32[2,8,32], index: 4, kind: input, shape index: {}]   ;;  %s3199_s5 = inlined_call_operand.hbm [shape: f32[2,8,32], index: 5, kind: input, shape index: {}]   ;;  %s3200_s6 = inlined_call_operand.vmem [shape: f32[32,1], index: 6, kind: input, shape index: {}]   ;;  %s3201_s7 = inlined_call_operand.<no memory space> [shape: f32[1,1], index: 7, kind: input, shape index: {}]   ;;  %s3202_s8 = inlined_call_operand.vmem [shape: f32[8,1], index: 8, kind: output, shape index: {0}]   ;;  %s3203_s9 = inlined_call_operand.hbm [shape: f32[2,8,32], index: 9, kind: output, shape index: {1}]   ;;  %s3204_s10 = inlined_call_operand.hbm [shape: f32[2,8,32], index: 10, kind: output, shape index: {2}]  }
   0x1   :  { %v16_v0 = vstv %s3201_s7 }
   0x2   :  { %17 = vst [vmem:[#allocation4] sm:$0x1] %v16_v0 }
   0x3   :  { %18 = vsyncpa [#allocation6], 0 }
   0x4   :  { %19 = vsyncpa [#allocation9], 0 }
   0x5   :  { %20 = vsyncpa [#allocation12], 0 }
   0x6   :  { %21 = vsyncpa [#allocation7], 0 }
   0x7   :  { %22 = vsyncpa [#allocation15], 0  ;;  %s2736_s15 = smov [#allocation8]   ;;  %s2737_s17 = smov [#allocation5]  }
   0x8   :  { %s42_s16 = sshll.u32 %s2736_s15, 4  ;;  %s28_s18 = sshll.u32 %s2737_s17, 4  ;;  %s43_s16 = int_to_ptr.vmem [resolvable:$true] %s42_s16  ;;  %s2810_s18 = int_to_ptr.vmem [resolvable:$true] %s28_s18 }
   0x9   :  { %s2594_s21 = scalar_lea.hbm %s3196_s2, 1024 }
   0xa   :  { %p2595_p0 = scmp.ne.s32.totalorder %s3196_s2, %s2594_s21  ;;  %p2598_p1 = scmp.lt.u32.totalorder %s2594_s21, %s3196_s2 }
   0xc   :  { %p2600_p2 = pnand %p2598_p1, %p2595_p0 }
   0xe   :  { %2603 = shalt.err (!%p2600_p2)
}
   0xf   :  { %s2604_s25 = scalar_lea.vmem %s43_s16, 1024  ;;  %p2609_p4 = scmp.lt.s32.totalorder %s43_s16, %s43_s16 }
  0x10   :  { %p2605_p3 = scmp.ne.s32.totalorder %s43_s16, %s2604_s25  ;;  %p2610_p5 = scmp.lt.s32.totalorder %s2604_s25, %s2604_s25 }
  0x12   :  { %p2611_p6 = por %p2610_p5, %p2609_p4 }
  0x14   :  { %p2612_p7 = pnand %p2611_p6, %p2605_p3 }
  0x16   :  { %2615 = shalt.err (!%p2612_p7)
}
  0x17   :  { %s2738_s26 = smov 128   ;;  %s2739_s27 = smov 8  }
  0x18   :  { %48 = dma.hbm_to_vmem [thread:$0]  %s3196_s2, 1024, %s43_s16, [#allocation9], %s2738_s26, %s2738_s26, %s2739_s27  }
  0x19   :  { %s2616_s12 = scalar_lea.hbm %s3194_s0, 1024 }
  0x1a   :  { %p2617_p8 = scmp.ne.s32.totalorder %s3194_s0, %s2616_s12  ;;  %p2620_p9 = scmp.lt.u32.totalorder %s2616_s12, %s3194_s0 }
  0x1c   :  { %p2622_p10 = pnand %p2620_p9, %p2617_p8 }
  0x1e   :  { %2625 = shalt.err (!%p2622_p10)
}
  0x1f   :  { %s2626_s19 = scalar_lea.vmem %s2810_s18, 1024  ;;  %p2631_p12 = scmp.lt.s32.totalorder %s2810_s18, %s2810_s18 }
  0x20   :  { %p2627_p11 = scmp.ne.s32.totalorder %s2810_s18, %s2626_s19  ;;  %p2632_p13 = scmp.lt.s32.totalorder %s2626_s19, %s2626_s19 }
  0x22   :  { %p2633_p0 = por %p2632_p13, %p2631_p12 }
  0x24   :  { %p2634_p1 = pnand %p2633_p0, %p2627_p11 }
  0x26   :  { %2637 = shalt.err (!%p2634_p1)
}
  0x27   :  { %34 = dma.hbm_to_vmem [thread:$0]  %s3194_s0, 1024, %s2810_s18, [#allocation6], %s2738_s26, %s2738_s26, %s2739_s27  }
  0x28   :  { %s2740_s20 = smov [#allocation10]   ;;  %s2638_s7 = scalar_lea.hbm %s3197_s3, 32 }
  0x29   :  { %s54_s21 = sshll.u32 %s2740_s20, 4  ;;  %p2639_p2 = scmp.ne.s32.totalorder %s3197_s3, %s2638_s7  ;;  %s55_s21 = int_to_ptr.vmem [resolvable:$true] %s54_s21 }
  0x2a   :  { %p2642_p3 = scmp.lt.u32.totalorder %s2638_s7, %s3197_s3 }
  0x2c   :  { %p2644_p4 = pnand %p2642_p3, %p2639_p2 }
  0x2e   :  { %2647 = shalt.err (!%p2644_p4)
}
  0x2f   :  { %s2648_s30 = scalar_lea.vmem %s55_s21, 32  ;;  %p2653_p6 = scmp.lt.s32.totalorder %s55_s21, %s55_s21 }
  0x30   :  { %p2649_p5 = scmp.ne.s32.totalorder %s55_s21, %s2648_s30  ;;  %p2654_p7 = scmp.lt.s32.totalorder %s2648_s30, %s2648_s30 }
  0x32   :  { %p2655_p8 = por %p2654_p7, %p2653_p6 }
  0x34   :  { %p2656_p9 = pnand %p2655_p8, %p2649_p5 }
  0x36   :  { %2659 = shalt.err (!%p2656_p9)
}
  0x37   :  { %s2741_s0 = smov 16   ;;  %s2742_s18 = smov 1  }
  0x38   :  { %60 = dma.hbm_to_vmem [thread:$0]  %s3197_s3, 32, %s55_s21, [#allocation9], %s2741_s0, %s2741_s0, %s2742_s18  }
  0x39   :  { %s2743_s13 = smov [#allocation11]   ;;  %s2660_s19 = scalar_lea.hbm %s3199_s5, 256 }
  0x3a   :  { %s68_s14 = sshll.u32 %s2743_s13, 4  ;;  %p2661_p10 = scmp.ne.s32.totalorder %s3199_s5, %s2660_s19  ;;  %s69_s14 = int_to_ptr.vmem [resolvable:$true] %s68_s14 }
  0x3b   :  { %p2664_p11 = scmp.lt.u32.totalorder %s2660_s19, %s3199_s5 }
  0x3d   :  { %p2666_p12 = pnand %p2664_p11, %p2661_p10 }
  0x3f   :  { %2669 = shalt.err (!%p2666_p12)
}
  0x40   :  { %s2670_s23 = scalar_lea.vmem %s69_s14, 256  ;;  %p2675_p0 = scmp.lt.s32.totalorder %s69_s14, %s69_s14 }
  0x41   :  { %p2671_p13 = scmp.ne.s32.totalorder %s69_s14, %s2670_s23  ;;  %p2676_p1 = scmp.lt.s32.totalorder %s2670_s23, %s2670_s23 }
  0x43   :  { %p2677_p2 = por %p2676_p1, %p2675_p0 }
  0x45   :  { %p2678_p3 = pnand %p2677_p2, %p2671_p13 }
  0x47   :  { %2681 = shalt.err (!%p2678_p3)
}
  0x48   :  { %74 = dma.hbm_to_vmem [thread:$0]  %s3199_s5, 256, %s69_s14, [#allocation12], %s2738_s26, %s2738_s26, %s2739_s27  }
  0x49   :  { %2726 = dma.done.wait [#allocation6], 1024  }
  0x4a   :  { %2727 = vsyncadd [#allocation6], 4294966272 }
  0x4b   :  { %2728 = dma.done.wait [#allocation9], 1056  }
  0x4c   :  { %2729 = vsyncadd [#allocation9], 4294966240 }
  0x4d   :  { %2730 = dma.done.wait [#allocation12], 256  }
  0x4e   :  { %2731 = vsyncadd [#allocation12], 4294967040  ;;  %v2744_v1 = vmov 0.0|0.0   ;;  %vm2745_vm0 = vmmov 0   ;;  %v2746_v2 = vmov 0.0   ;;  %v91_v3 = vld [vmem:[#allocation8] sm:$0xff] }
  0x4f   :  { %2370 = vmatprep.subr.bf16.mxu0 %v2744_v1  ;;  %2171 = vmatprep.mubr.msk.f32.mxu0 %vm2745_vm0, %v2746_v2  ;;  %v92_v4 = vld [vmem:[#allocation8 + $0x8] sm:$0xff]  ;;  %v93_v5 = vld [vmem:[#allocation8 + $0x10] sm:$0xff]  ;;  %v94_v7 = vld [vmem:[#allocation8 + $0x18] sm:$0xff]  ;;  %vm98_vm1 = vcmask 261120   ;;  %s2747_s24 = smov 32   ;;  %s2748_s25 = smov 64  }
  0x50   :  { %2376 = vmatprep.subr.bf16.mxu1 %v2744_v1  ;;  %2182 = vmatprep.mubr.msk.f32.mxu1 %vm2745_vm0, %v2746_v2  ;;  %v2880_v6 = vpack.c.bf16 %v92_v4, %v91_v3  ;;  %v2883_v8 = vpack.c.bf16 %v94_v7, %v93_v5  ;;  %v95_v9 = vld [vmem:[%s3198_s4] sm:$0xff]  ;;  %v205_v30 = vld [vmem:[#allocation5 + $0x8] sm:$0xff]  ;;  %v308_v48 = vld [vmem:[#allocation5 + $0x10] sm:$0xff]  ;;  %s2749_s23 = smov 96   ;;  %s2751_s21 = smov [#allocation14]  }
  0x51   :  { %v97_v10 = vld [vmem:[#allocation5] sm:$0xff]  ;;  %v411_v4 = vld [vmem:[#allocation5 + $0x18] sm:$0xff]  ;;  %s2018_s5 = sshll.u32 %s2751_s21, 4  ;;  %s3154_s5 = int_to_ptr.vmem [resolvable:$true] %s2018_s5 }
  0x52   :  { %2372 = vmatpush3.bf16.msra.mxu0 %v2880_v6  ;;  %2378 = vmatpush3.bf16.msra.mxu1 %v2880_v6  ;;  %v96_v15 = vld [vmem:[#allocation11] sm:$0xff] }
  0x53   :  { %2373 = vmatprep.subr.bf16.mxu0 %v2744_v1  ;;  %2379 = vmatprep.subr.bf16.mxu1 %v2744_v1 }
  0x56   :  { %2375 = vmatpush3.bf16.msra.mxu0 %v2883_v8  ;;  %2381 = vmatpush3.bf16.msra.mxu1 %v2883_v8 }
  0x57   :  { %2382 = vmatprep.subr.bf16.mxu0 %v2744_v1  ;;  %2388 = vmatprep.subr.bf16.mxu1 %v2744_v1 }
  0x59   :  { %2172 = vmatmul.mubr.msk.f32.vlgmr.msra.gmra.mrb[0].mxu0 %vm98_vm1, %v95_v9 }
  0x5a   :  { %2384 = vmatpush3.bf16.msra.mxu0 %v2880_v6  ;;  %2193 = vmatprep.mubr.msk.f32.mxu0 %vm2745_vm0, %v2746_v2 }
  0x5b   :  { %2385 = vmatprep.subr.bf16.mxu0 %v2744_v1 }
  0x5e   :  { %2387 = vmatpush3.bf16.msra.mxu0 %v2883_v8 }
  0x5f   :  { %2394 = vmatprep.subr.bf16.mxu0 %v2744_v1 }
 0x12c   :  { %v168_v11 = vpop.f32.mrb[0].mxu0 }
 0x12d   :  { %v172_v12 = vadd.f32 %v168_v11, %v97_v10  ;;  %v2173_v13 = vpop.f32.mrb[1].mxu0 }
 0x12f   :  { %2496 = vtanh.f32 %v172_v12  ;;  %v173_v16 = vmul.f32 0.5, %v172_v12 }
 0x131   :  { %2498 = vtanh.f32 %v173_v16 }
 0x139   :  { %v2497_v14 = vpop.eup %2496 }
 0x13a   :  { %184 = vrot.lane.b32.xlu0 %v2497_v14, %s2747_s24 }
 0x13b   :  { %v2499_v17 = vpop.eup %2498 }
 0x13c   :  { %v175_v18 = vmul.f32 0.5, %v2499_v17 }
 0x13e   :  { %179 = vrot.lane.b32.xlu0 %v96_v15, %s2747_s24  ;;  %v176_v19 = vadd.f32 0.5, %v175_v18 }
 0x1ac   :  { %v185_v20 = vpop.permute.xlu0 %184 }
 0x1ad   :  { %v187_v21 = vmul.f32 %v185_v20, %v176_v19 }
 0x1af   :  { %189 = vrot.lane.b32.xlu1 %v187_v21, %s2747_s24 }
 0x1b0   :  { %v180_v22 = vpop.permute.xlu0 %179 }
 0x1b1   :  { %v182_v23 = vmul.f32 %v180_v22, %v176_v19 }
 0x221   :  { %v190_v24 = vpop.permute.xlu1 %189 }
 0x222   :  { %v192_v25 = vadd.f32 %v190_v24, %v182_v23  ;;  %v514_v24 = vld [vmem:[#allocation5 + $0x20] sm:$0xff] }
 0x224   :  { %2500 = vtanh.f32 %v192_v25 }
 0x22e   :  { %v2501_v26 = vpop.eup %2500 }
 0x22f   :  { %195 = vrot.lane.b32.xlu1 %v2501_v26, %s2747_s24 }
 0x2a1   :  { %v196_v27 = vpop.permute.xlu1 %195 }
 0x2a2   :  { %v198_v28 = vmul.f32 %v196_v27, %v176_v19 }
 0x2a4   :  { %200 = vrot.lane.b32.xlu0 %v198_v28, %s2748_s25 }
 0x316   :  { %v201_v29 = vpop.permute.xlu0 %200 }
 0x317   :  { %203 = vst.msk [vmem:[#allocation2] sm:$0xff] %vm98_vm1, %v201_v29  ;;  %2183 = vmatmul.mubr.msk.f32.vlgmr.msra.gmra.mrb[0].mxu1 %vm98_vm1, %v201_v29 }
 0x318   :  { %2390 = vmatpush3.bf16.msra.mxu1 %v2880_v6  ;;  %2204 = vmatprep.mubr.msk.f32.mxu1 %vm2745_vm0, %v2746_v2 }
 0x319   :  { %2391 = vmatprep.subr.bf16.mxu1 %v2744_v1 }
 0x31c   :  { %2393 = vmatpush3.bf16.msra.mxu1 %v2883_v8 }
 0x31d   :  { %2400 = vmatprep.subr.bf16.mxu1 %v2744_v1 }
 0x3ea   :  { %v274_v31 = vpop.f32.mrb[0].mxu1 }
 0x3eb   :  { %v278_v32 = vadd.f32 %v274_v31, %v205_v30  ;;  %v2184_v33 = vpop.f32.mrb[1].mxu1 }
 0x3ed   :  { %2502 = vtanh.f32 %v278_v32  ;;  %v279_v35 = vmul.f32 0.5, %v278_v32 }
 0x3ef   :  { %2504 = vtanh.f32 %v279_v35 }
 0x3f7   :  { %v2503_v34 = vpop.eup %2502 }
 0x3f8   :  { %286 = vrot.lane.b32.xlu1 %v2503_v34, %s2747_s24 }
 0x3f9   :  { %v2505_v36 = vpop.eup %2504 }
 0x3fa   :  { %v281_v37 = vmul.f32 0.5, %v2505_v36 }
 0x3fc   :  { %v282_v38 = vadd.f32 0.5, %v281_v37 }
 0x3fe   :  { %v284_v41 = vmul.f32 %v282_v38, %v192_v25 }
 0x46a   :  { %v287_v39 = vpop.permute.xlu1 %286 }
 0x46b   :  { %v289_v40 = vmul.f32 %v287_v39, %v282_v38 }
 0x46d   :  { %291 = vrot.lane.b32.xlu0 %v289_v40, %s2747_s24 }
 0x4df   :  { %v292_v42 = vpop.permute.xlu0 %291 }
 0x4e0   :  { %v294_v43 = vadd.f32 %v292_v42, %v284_v41  ;;  %v617_v42 = vld [vmem:[#allocation5 + $0x28] sm:$0xff] }
 0x4e2   :  { %2506 = vtanh.f32 %v294_v43 }
 0x4ec   :  { %v2507_v44 = vpop.eup %2506 }
 0x4ed   :  { %297 = vrot.lane.b32.xlu1 %v2507_v44, %s2747_s24 }
 0x55f   :  { %v298_v45 = vpop.permute.xlu1 %297 }
 0x560   :  { %v300_v46 = vmul.f32 %v298_v45, %v282_v38 }
 0x562   :  { %302 = vrot.lane.b32.xlu0 %v300_v46, %s2748_s25 }
 0x5d4   :  { %v303_v47 = vpop.permute.xlu0 %302 }
 0x5d5   :  { %306 = vst.msk [vmem:[#allocation2 + $0x8] sm:$0xff] %vm98_vm1, %v303_v47  ;;  %2194 = vmatmul.mubr.msk.f32.vlgmr.msra.gmra.mrb[2].mxu0 %vm98_vm1, %v303_v47 }
 0x5d6   :  { %2396 = vmatpush3.bf16.msra.mxu0 %v2880_v6  ;;  %2215 = vmatprep.mubr.msk.f32.mxu0 %vm2745_vm0, %v2746_v2 }
 0x5d7   :  { %2397 = vmatprep.subr.bf16.mxu0 %v2744_v1 }
 0x5da   :  { %2399 = vmatpush3.bf16.msra.mxu0 %v2883_v8 }
 0x5db   :  { %2406 = vmatprep.subr.bf16.mxu0 %v2744_v1 }
 0x6a8   :  { %v377_v49 = vpop.f32.mrb[2].mxu0 }
 0x6a9   :  { %v381_v50 = vadd.f32 %v377_v49, %v308_v48  ;;  %v2195_v51 = vpop.f32.mrb[3].mxu0 }
 0x6ab   :  { %2508 = vtanh.f32 %v381_v50  ;;  %v382_v53 = vmul.f32 0.5, %v381_v50 }
 0x6ad   :  { %2510 = vtanh.f32 %v382_v53 }
 0x6b5   :  { %v2509_v52 = vpop.eup %2508 }
 0x6b6   :  { %389 = vrot.lane.b32.xlu1 %v2509_v52, %s2747_s24 }
 0x6b7   :  { %v2511_v54 = vpop.eup %2510 }
 0x6b8   :  { %v384_v55 = vmul.f32 0.5, %v2511_v54  ;;  %v931_v54 = vld [vmem:[%s3195_s1] sm:$0xff] }
 0x6ba   :  { %v385_v56 = vadd.f32 0.5, %v384_v55  ;;  %v932_v55 = vld [vmem:[%s3195_s1 + $0x8] sm:$0xff] }
 0x6bc   :  { %v387_v59 = vmul.f32 %v385_v56, %v294_v43 }
 0x728   :  { %v390_v57 = vpop.permute.xlu1 %389 }
 0x729   :  { %v392_v58 = vmul.f32 %v390_v57, %v385_v56 }
 0x72b   :  { %394 = vrot.lane.b32.xlu0 %v392_v58, %s2747_s24 }
 0x79d   :  { %v395_v60 = vpop.permute.xlu0 %394 }
 0x79e   :  { %v397_v61 = vadd.f32 %v395_v60, %v387_v59  ;;  %v933_v60 = vld [vmem:[%s3195_s1 + $0x10] sm:$0xff] }
 0x7a0   :  { %2512 = vtanh.f32 %v397_v61 }
 0x7aa   :  { %v2513_v62 = vpop.eup %2512 }
 0x7ab   :  { %400 = vrot.lane.b32.xlu1 %v2513_v62, %s2747_s24 }
 0x81d   :  { %v401_v63 = vpop.permute.xlu1 %400 }
 0x81e   :  { %v403_v0 = vmul.f32 %v401_v63, %v385_v56  ;;  %v2418_v56 = vpack.c.bf16 %v932_v55, %v931_v54 }
 0x820   :  { %405 = vrot.lane.b32.xlu0 %v403_v0, %s2748_s25  ;;  %v943_v0 = vld [vmem:[#allocation2] sm:$0xff] }
 0x892   :  { %v406_v3 = vpop.permute.xlu0 %405 }
 0x893   :  { %409 = vst.msk [vmem:[#allocation2 + $0x10] sm:$0xff] %vm98_vm1, %v406_v3  ;;  %2205 = vmatmul.mubr.msk.f32.vlgmr.msra.gmra.mrb[2].mxu1 %vm98_vm1, %v406_v3  ;;  %v944_v3 = vld [vmem:[#allocation2 + $0x8] sm:$0xff] }
 0x894   :  { %2402 = vmatpush3.bf16.msra.mxu1 %v2880_v6  ;;  %2226 = vmatprep.mubr.msk.f32.mxu1 %vm2745_vm0, %v2746_v2 }
 0x895   :  { %2403 = vmatprep.subr.bf16.mxu1 %v2744_v1 }
 0x898   :  { %2405 = vmatpush3.bf16.msra.mxu1 %v2883_v8 }
 0x899   :  { %2412 = vmatprep.subr.bf16.mxu1 %v2744_v1 }
 0x966   :  { %v480_v5 = vpop.f32.mrb[2].mxu1 }
 0x967   :  { %v484_v7 = vadd.f32 %v480_v5, %v411_v4  ;;  %v2206_v9 = vpop.f32.mrb[3].mxu1  ;;  %v945_v4 = vld [vmem:[#allocation2 + $0x10] sm:$0xff] }
 0x969   :  { %2514 = vtanh.f32 %v484_v7  ;;  %v485_v11 = vmul.f32 0.5, %v484_v7 }
 0x96b   :  { %2516 = vtanh.f32 %v485_v11 }
 0x973   :  { %v2515_v10 = vpop.eup %2514 }
 0x974   :  { %492 = vrot.lane.b32.xlu1 %v2515_v10, %s2747_s24  ;;  %v720_v10 = vld [vmem:[#allocation5 + $0x30] sm:$0xff] }
 0x975   :  { %v2517_v12 = vpop.eup %2516 }
 0x976   :  { %v487_v13 = vmul.f32 0.5, %v2517_v12 }
 0x978   :  { %v488_v14 = vadd.f32 0.5, %v487_v13 }
 0x97a   :  { %v490_v17 = vmul.f32 %v488_v14, %v397_v61  ;;  %v934_v61 = vld [vmem:[%s3195_s1 + $0x18] sm:$0xff] }
 0x97b   :  { %v2422_v62 = vpack.c.bf16 %v934_v61, %v933_v60 }
 0x9e6   :  { %v493_v15 = vpop.permute.xlu1 %492 }
 0x9e7   :  { %v495_v16 = vmul.f32 %v493_v15, %v488_v14 }
 0x9e9   :  { %497 = vrot.lane.b32.xlu0 %v495_v16, %s2747_s24 }
 0xa5b   :  { %v498_v18 = vpop.permute.xlu0 %497 }
 0xa5c   :  { %v500_v19 = vadd.f32 %v498_v18, %v490_v17 }
 0xa5e   :  { %2518 = vtanh.f32 %v500_v19 }
 0xa68   :  { %v2519_v20 = vpop.eup %2518 }
 0xa69   :  { %503 = vrot.lane.b32.xlu1 %v2519_v20, %s2747_s24 }
 0xadb   :  { %v504_v21 = vpop.permute.xlu1 %503 }
 0xadc   :  { %v506_v22 = vmul.f32 %v504_v21, %v488_v14 }
 0xade   :  { %508 = vrot.lane.b32.xlu0 %v506_v22, %s2748_s25 }
 0xb50   :  { %v509_v23 = vpop.permute.xlu0 %508 }
 0xb51   :  { %512 = vst.msk [vmem:[#allocation2 + $0x18] sm:$0xff] %vm98_vm1, %v509_v23  ;;  %2216 = vmatmul.mubr.msk.f32.vlgmr.msra.gmra.mrb[4].mxu0 %vm98_vm1, %v509_v23 }
 0xb52   :  { %2408 = vmatpush3.bf16.msra.mxu0 %v2880_v6  ;;  %2237 = vmatprep.mubr.msk.f32.mxu0 %vm2745_vm0, %v2746_v2 }
 0xb53   :  { %2409 = vmatprep.subr.bf16.mxu0 %v2744_v1 }
 0xb56   :  { %2411 = vmatpush3.bf16.msra.mxu0 %v2883_v8 }
 0xb57   :  { %2419 = vmatprep.subr.bf16.mxu0 %v2418_v56 }
 0xb58   :  { %v946_v5 = vld [vmem:[#allocation2 + $0x18] sm:$0xff] }
 0xc24   :  { %v583_v25 = vpop.f32.mrb[4].mxu0 }
 0xc25   :  { %v587_v26 = vadd.f32 %v583_v25, %v514_v24  ;;  %v2217_v27 = vpop.f32.mrb[5].mxu0 }
 0xc27   :  { %2520 = vtanh.f32 %v587_v26  ;;  %v588_v29 = vmul.f32 0.5, %v587_v26 }
 0xc29   :  { %2522 = vtanh.f32 %v588_v29 }
 0xc31   :  { %v2521_v28 = vpop.eup %2520 }
 0xc32   :  { %595 = vrot.lane.b32.xlu1 %v2521_v28, %s2747_s24 }
 0xc33   :  { %v2523_v30 = vpop.eup %2522 }
 0xc34   :  { %v590_v31 = vmul.f32 0.5, %v2523_v30 }
 0xc36   :  { %v591_v32 = vadd.f32 0.5, %v590_v31  ;;  %v1089_v31 = vld [vmem:[#allocation8 + $0x20] sm:$0xff] }
 0xc38   :  { %v593_v35 = vmul.f32 %v591_v32, %v500_v19 }
 0xca4   :  { %v596_v33 = vpop.permute.xlu1 %595 }
 0xca5   :  { %v598_v34 = vmul.f32 %v596_v33, %v591_v32 }
 0xca7   :  { %600 = vrot.lane.b32.xlu0 %v598_v34, %s2747_s24  ;;  %v1091_v34 = vld [vmem:[#allocation8 + $0x30] sm:$0xff] }
 0xd19   :  { %v601_v36 = vpop.permute.xlu0 %600 }
 0xd1a   :  { %v603_v37 = vadd.f32 %v601_v36, %v593_v35  ;;  %v1092_v35 = vld [vmem:[#allocation8 + $0x38] sm:$0xff] }
 0xd1b   :  { %v3007_v36 = vpack.c.bf16 %v1092_v35, %v1091_v34 }
 0xd1c   :  { %2524 = vtanh.f32 %v603_v37 }
 0xd26   :  { %v2525_v38 = vpop.eup %2524 }
 0xd27   :  { %606 = vrot.lane.b32.xlu1 %v2525_v38, %s2747_s24 }
 0xd99   :  { %v607_v39 = vpop.permute.xlu1 %606 }
 0xd9a   :  { %v609_v40 = vmul.f32 %v607_v39, %v591_v32  ;;  %v1090_v32 = vld [vmem:[#allocation8 + $0x28] sm:$0xff] }
 0xd9b   :  { %v3003_v33 = vpack.c.bf16 %v1090_v32, %v1089_v31  ;;  %v1096_v39 = vld [vmem:[#allocation11 + $0x8] sm:$0xff] }
 0xd9c   :  { %611 = vrot.lane.b32.xlu0 %v609_v40, %s2748_s25 }
 0xe0e   :  { %v612_v41 = vpop.permute.xlu0 %611 }
 0xe0f   :  { %615 = vst.msk [vmem:[#allocation2 + $0x20] sm:$0xff] %vm98_vm1, %v612_v41  ;;  %2227 = vmatmul.mubr.msk.f32.vlgmr.msra.gmra.mrb[4].mxu1 %vm98_vm1, %v612_v41  ;;  %v2055_v41 = vld [vmem:[%s3198_s4 + $0x8] sm:$0xff] }
 0xe10   :  { %2414 = vmatpush3.bf16.msra.mxu1 %v2880_v6  ;;  %2248 = vmatprep.mubr.msk.f32.mxu1 %vm2745_vm0, %v2746_v2 }
 0xe11   :  { %2415 = vmatprep.subr.bf16.mxu1 %v2744_v1 }
 0xe14   :  { %2417 = vmatpush3.bf16.msra.mxu1 %v2883_v8 }
 0xe15   :  { %2426 = vmatprep.subr.bf16.mxu1 %v2744_v1 }
 0xe16   :  { %v947_v7 = vld [vmem:[#allocation2 + $0x20] sm:$0xff] }
 0xee2   :  { %v686_v43 = vpop.f32.mrb[4].mxu1 }
 0xee3   :  { %v690_v44 = vadd.f32 %v686_v43, %v617_v42  ;;  %v2228_v45 = vpop.f32.mrb[5].mxu1 }
 0xee4   :  { %v3032_v45 = vld [vmem:[#allocation10 + $0x1] ss:$0 sm:$0xff] }
 0xee5   :  { %2526 = vtanh.f32 %v690_v44  ;;  %v691_v47 = vmul.f32 0.5, %v690_v44 }
 0xee7   :  { %2528 = vtanh.f32 %v691_v47 }
 0xeef   :  { %v2527_v46 = vpop.eup %2526 }
 0xef0   :  { %698 = vrot.lane.b32.xlu1 %v2527_v46, %s2747_s24 }
 0xef1   :  { %v2529_v6 = vpop.eup %2528 }
 0xef2   :  { %v693_v48 = vmul.f32 0.5, %v2529_v6 }
 0xef4   :  { %v694_v49 = vadd.f32 0.5, %v693_v48 }
 0xef6   :  { %v696_v8 = vmul.f32 %v694_v49, %v603_v37 }
 0xf62   :  { %v699_v50 = vpop.permute.xlu1 %698 }
 0xf63   :  { %v701_v51 = vmul.f32 %v699_v50, %v694_v49 }
 0xf65   :  { %703 = vrot.lane.b32.xlu0 %v701_v51, %s2747_s24 }
 0xfd7   :  { %v704_v52 = vpop.permute.xlu0 %703 }
 0xfd8   :  { %v706_v53 = vadd.f32 %v704_v52, %v696_v8 }
 0xfda   :  { %2530 = vtanh.f32 %v706_v53 }
 0xfe4   :  { %v2531_v57 = vpop.eup %2530 }
 0xfe5   :  { %709 = vrot.lane.b32.xlu1 %v2531_v57, %s2747_s24  ;;  %v823_v57 = vld [vmem:[#allocation5 + $0x38] sm:$0xff] }
0x1057   :  { %v710_v58 = vpop.permute.xlu1 %709 }
0x1058   :  { %v712_v59 = vmul.f32 %v710_v58, %v694_v49 }
0x105a   :  { %714 = vrot.lane.b32.xlu0 %v712_v59, %s2748_s25 }
0x10cc   :  { %v715_v63 = vpop.permute.xlu0 %714 }
0x10cd   :  { %718 = vst.msk [vmem:[#allocation2 + $0x28] sm:$0xff] %vm98_vm1, %v715_v63  ;;  %2238 = vmatmul.mubr.msk.f32.vlgmr.msra.gmra.mrb[6].mxu0 %vm98_vm1, %v715_v63 }
0x10ce   :  { %2421 = vmatpush3.bf16.msra.mxu0 %v2418_v56  ;;  %2259 = vmatprep.mubr.msk.f32.mxu0 %vm98_vm1, %v943_v0 }
0x10cf   :  { %2423 = vmatprep.subr.bf16.mxu0 %v2422_v62 }
0x10d2   :  { %2425 = vmatpush3.bf16.msra.mxu0 %v2422_v62 }
0x10d3   :  { %2438 = vmatprep.subr.bf16.mxu0 %v2744_v1 }
0x10d4   :  { %v948_v9 = vld [vmem:[#allocation2 + $0x28] sm:$0xff] }
0x10d5   :  { %2260 = vmatmul.mubr.msk.f32.vlgmr.msra.gmra.mrb[8].mxu0 %vm98_vm1, %v944_v3 }
0x10d6   :  { %2262 = vmatprep.mubr.msk.f32.mxu0 %vm98_vm1, %v945_v4  ;;  %2440 = vmatpush3.bf16.msra.mxu0 %v3003_v33 }
0x10d7   :  { %2441 = vmatprep.subr.bf16.mxu0 %v2744_v1 }
0x10d9   :  { %2263 = vmatmul.mubr.msk.f32.gmra.mrb[10].mxu0 %vm98_vm1, %v946_v5 }
0x10da   :  { %2265 = vmatprep.mubr.msk.f32.mxu0 %vm98_vm1, %v947_v7  ;;  %2443 = vmatpush3.bf16.msra.mxu0 %v3007_v36 }
0x10db   :  { %2450 = vmatprep.subr.bf16.mxu0 %v2744_v1 }
0x10dd   :  { %2266 = vmatmul.mubr.msk.f32.gmra.mrb[12].mxu0 %vm98_vm1, %v948_v9 }
0x11a0   :  { %v789_v11 = vpop.f32.mrb[6].mxu0 }
0x11a1   :  { %v793_v12 = vadd.f32 %v789_v11, %v720_v10  ;;  %v2239_v13 = vpop.f32.mrb[7].mxu0 }
0x11a3   :  { %2532 = vtanh.f32 %v793_v12  ;;  %v794_v21 = vmul.f32 0.5, %v793_v12 }
0x11a5   :  { %2534 = vtanh.f32 %v794_v21 }
0x11a8   :  { %v2987_v14 = vpop.f32.mrb[8].mxu0 }
0x11a9   :  { %v1041_v15 = vpop.f32.mrb[9].mxu0 }
0x11aa   :  { %v1042_v46 = vadd.f32 %v3032_v45, %v1041_v15 }
0x11ac   :  { %v2989_v16 = vpop.f32.mrb[10].mxu0 }
0x11ad   :  { %v2533_v17 = vpop.eup %2532  ;;  %v2991_v18 = vpop.f32.mrb[11].mxu0 }
0x11ae   :  { %801 = vrot.lane.b32.xlu1 %v2533_v17, %s2747_s24 }
0x11af   :  { %v2535_v22 = vpop.eup %2534 }
0x11b0   :  { %v2994_v19 = vpop.f32.mrb[12].mxu0  ;;  %v796_v23 = vmul.f32 0.5, %v2535_v22 }
0x11b1   :  { %v2996_v20 = vpop.f32.mrb[13].mxu0 }
0x11b2   :  { %v797_v24 = vadd.f32 0.5, %v796_v23  ;;  %v1047_v23 = vadd.f32 %v2987_v14, %v3032_v45 }
0x11b4   :  { %v799_v27 = vmul.f32 %v797_v24, %v706_v53 }
0x1220   :  { %v802_v25 = vpop.permute.xlu1 %801 }
0x1221   :  { %v804_v26 = vmul.f32 %v802_v25, %v797_v24 }
0x1223   :  { %806 = vrot.lane.b32.xlu0 %v804_v26, %s2747_s24 }
0x1295   :  { %v807_v28 = vpop.permute.xlu0 %806 }
0x1296   :  { %v2999_v29 = vadd.f32 %v807_v28, %v799_v27 }
0x1298   :  { %2536 = vtanh.f32 %v2999_v29 }
0x12a2   :  { %v2537_v30 = vpop.eup %2536 }
0x12a3   :  { %812 = vrot.lane.b32.xlu1 %v2537_v30, %s2747_s24 }
0x1315   :  { %v813_v37 = vpop.permute.xlu1 %812 }
0x1316   :  { %v815_v38 = vmul.f32 %v813_v37, %v797_v24 }
0x1318   :  { %817 = vrot.lane.b32.xlu0 %v815_v38, %s2748_s25 }
0x131c   :  { %1178 = vrot.lane.b32.xlu0 %v1096_v39, %s2747_s24 }
0x138a   :  { %v818_v40 = vpop.permute.xlu0 %817 }
0x138b   :  { %821 = vst.msk [vmem:[#allocation2 + $0x30] sm:$0xff] %vm98_vm1, %v818_v40  ;;  %2249 = vmatmul.mubr.msk.f32.vlgmr.msra.gmra.mrb[6].mxu1 %vm98_vm1, %v818_v40 }
0x138c   :  { %2428 = vmatpush3.bf16.msra.mxu1 %v3003_v33  ;;  %2279 = vmatprep.mubr.msk.f32.mxu1 %vm2745_vm0, %v2746_v2 }
0x138d   :  { %2429 = vmatprep.subr.bf16.mxu1 %v2744_v1 }
0x138e   :  { %v1179_v55 = vpop.permute.xlu0 %1178 }
0x1390   :  { %2431 = vmatpush3.bf16.msra.mxu1 %v3007_v36 }
0x1391   :  { %2432 = vmatprep.subr.bf16.mxu1 %v2744_v1 }
0x1392   :  { %v949_v42 = vld [vmem:[#allocation2 + $0x30] sm:$0xff] }
0x1393   :  { %2280 = vmatmul.mubr.msk.f32.vlgmr.msra.gmra.mrb[8].mxu1 %vm98_vm1, %v2055_v41  ;;  %2268 = vmatprep.mubr.msk.f32.mxu0 %vm98_vm1, %v949_v42 }
0x1394   :  { %2434 = vmatpush3.bf16.msra.mxu1 %v3003_v33  ;;  %2290 = vmatprep.mubr.msk.f32.mxu1 %vm2745_vm0, %v2746_v2 }
0x1395   :  { %2435 = vmatprep.subr.bf16.mxu1 %v2744_v1 }
0x1398   :  { %2437 = vmatpush3.bf16.msra.mxu1 %v3007_v36 }
0x1399   :  { %2444 = vmatprep.subr.bf16.mxu1 %v2744_v1 }
0x145e   :  { %v892_v43 = vpop.f32.mrb[6].mxu1 }
0x145f   :  { %v2250_v44 = vpop.f32.mrb[7].mxu1  ;;  %v896_v60 = vadd.f32 %v892_v43, %v823_v57 }
0x1461   :  { %v897_v63 = vmul.f32 0.5, %v896_v60 }
0x1466   :  { %v1167_v47 = vpop.f32.mrb[8].mxu1 }
0x1467   :  { %v1171_v6 = vadd.f32 %v1167_v47, %v1042_v46  ;;  %v2281_v48 = vpop.f32.mrb[9].mxu1  ;;  %v1052_v47 = vadd.f32 %v3032_v45, %v2991_v18 }
0x1469   :  { %2538 = vtanh.f32 %v1171_v6  ;;  %v1172_v50 = vmul.f32 0.5, %v1171_v6 }
0x146b   :  { %2540 = vtanh.f32 %v1172_v50 }
0x1473   :  { %v2539_v49 = vpop.eup %2538 }
0x1474   :  { %1183 = vrot.lane.b32.xlu1 %v2539_v49, %s2747_s24 }
0x1475   :  { %v2541_v51 = vpop.eup %2540 }
0x1476   :  { %v1174_v8 = vmul.f32 0.5, %v2541_v51 }
0x1478   :  { %v1175_v52 = vadd.f32 0.5, %v1174_v8 }
0x147a   :  { %v1181_v56 = vmul.f32 %v1179_v55, %v1175_v52 }
0x14e6   :  { %v1184_v53 = vpop.permute.xlu1 %1183 }
0x14e7   :  { %v1186_v54 = vmul.f32 %v1184_v53, %v1175_v52 }
0x14e9   :  { %1188 = vrot.lane.b32.xlu1 %v1186_v54, %s2747_s24 }
0x155b   :  { %v1189_v58 = vpop.permute.xlu1 %1188 }
0x155c   :  { %v1191_v59 = vadd.f32 %v1189_v58, %v1181_v56 }
0x155e   :  { %2542 = vtanh.f32 %v1191_v59 }
0x155f   :  { %2544 = vtanh.f32 %v896_v60 }
0x1560   :  { %2546 = vtanh.f32 %v897_v63 }
0x1568   :  { %v2543_v61 = vpop.eup %2542 }
0x1569   :  { %1194 = vrot.lane.b32.xlu0 %v2543_v61, %s2747_s24  ;;  %v2545_v62 = vpop.eup %2544 }
0x156a   :  { %v2547_v0 = vpop.eup %2546 }
0x156b   :  { %v899_v3 = vmul.f32 0.5, %v2547_v0 }
0x156d   :  { %904 = vrot.lane.b32.xlu0 %v2545_v62, %s2747_s24  ;;  %v900_v7 = vadd.f32 0.5, %v899_v3  ;;  %v1057_v62 = vadd.f32 %v2989_v16, %v3032_v45 }
0x156f   :  { %v902_v12 = vmul.f32 %v900_v7, %v2999_v29 }
0x15db   :  { %v1195_v4 = vpop.permute.xlu0 %1194 }
0x15dc   :  { %v1197_v5 = vmul.f32 %v1195_v4, %v1175_v52 }
0x15de   :  { %1201 = vrot.lane.b32.xlu1 %v1197_v5, %s2748_s25 }
0x15df   :  { %v905_v9 = vpop.permute.xlu0 %904 }
0x15e0   :  { %v907_v10 = vmul.f32 %v905_v9, %v900_v7 }
0x15e2   :  { %909 = vrot.lane.b32.xlu0 %v907_v10, %s2747_s24 }
0x1650   :  { %v1202_v11 = vpop.permute.xlu1 %1201 }
0x1651   :  { %2291 = vmatmul.mubr.msk.f32.vlgmr.msra.gmra.mrb[10].mxu1 %vm98_vm1, %v1202_v11 }
0x1652   :  { %2446 = vmatpush3.bf16.msra.mxu1 %v3003_v33  ;;  %2312 = vmatprep.mubr.msk.f32.mxu1 %vm2745_vm0, %v2746_v2 }
0x1653   :  { %2447 = vmatprep.subr.bf16.mxu1 %v2744_v1 }
0x1654   :  { %v910_v13 = vpop.permute.xlu0 %909 }
0x1655   :  { %v3047_v15 = vadd.f32 %v910_v13, %v902_v12 }
0x1656   :  { %2449 = vmatpush3.bf16.msra.mxu1 %v3007_v36 }
0x1657   :  { %2548 = vtanh.f32 %v3047_v15  ;;  %2456 = vmatprep.subr.bf16.mxu1 %v2744_v1 }
0x1661   :  { %v2549_v17 = vpop.eup %2548 }
0x1662   :  { %915 = vrot.lane.b32.xlu0 %v2549_v17, %s2747_s24 }
0x16d4   :  { %v916_v21 = vpop.permute.xlu0 %915 }
0x16d5   :  { %v918_v22 = vmul.f32 %v916_v21, %v900_v7 }
0x16d7   :  { %920 = vrot.lane.b32.xlu0 %v918_v22, %s2748_s25 }
0x1724   :  { %v1271_v24 = vpop.f32.mrb[10].mxu1 }
0x1725   :  { %v1275_v25 = vadd.f32 %v1271_v24, %v1047_v23  ;;  %v2292_v26 = vpop.f32.mrb[11].mxu1 }
0x1727   :  { %2550 = vtanh.f32 %v1275_v25  ;;  %v1276_v30 = vmul.f32 0.5, %v1275_v25  ;;  %v1062_v25 = vadd.f32 %v3032_v45, %v2996_v20 }
0x1729   :  { %2552 = vtanh.f32 %v1276_v30 }
0x1731   :  { %v2551_v27 = vpop.eup %2550 }
0x1732   :  { %1283 = vrot.lane.b32.xlu1 %v2551_v27, %s2747_s24 }
0x1733   :  { %v2553_v14 = vpop.eup %2552 }
0x1734   :  { %v1278_v31 = vmul.f32 0.5, %v2553_v14 }
0x1736   :  { %v1279_v32 = vadd.f32 0.5, %v1278_v31 }
0x1738   :  { %v1281_v37 = vmul.f32 %v1279_v32, %v1191_v59 }
0x1749   :  { %v921_v28 = vpop.permute.xlu0 %920 }
0x174a   :  { %924 = vst.msk [vmem:[#allocation2 + $0x38] sm:$0xff] %vm98_vm1, %v921_v28  ;;  %925 = vst.msk [vmem:[#allocation13] sm:$0xff] %vm98_vm1, %v921_v28 }
0x1751   :  { %v950_v29 = vld [vmem:[#allocation2 + $0x38] sm:$0xff] }
0x1752   :  { %2269 = vmatmul.mubr.msk.f32.gmra.mrb[14].mxu0 %vm98_vm1, %v950_v29 }
0x1753   :  { %2301 = vmatprep.mubr.msk.f32.mxu0 %vm2745_vm0, %v2746_v2 }
0x17a4   :  { %v1284_v34 = vpop.permute.xlu1 %1283 }
0x17a5   :  { %v1286_v35 = vmul.f32 %v1284_v34, %v1279_v32 }
0x17a7   :  { %1288 = vrot.lane.b32.xlu1 %v1286_v35, %s2747_s24 }
0x1819   :  { %v1289_v38 = vpop.permute.xlu1 %1288 }
0x181a   :  { %v1291_v39 = vadd.f32 %v1289_v38, %v1281_v37 }
0x181c   :  { %2554 = vtanh.f32 %v1291_v39 }
0x1825   :  { %v3063_v40 = vpop.f32.mrb[14].mxu0 }
0x1826   :  { %v2555_v41 = vpop.eup %2554  ;;  %v3065_v42 = vpop.f32.mrb[15].mxu0 }
0x1827   :  { %1294 = vrot.lane.b32.xlu1 %v2555_v41, %s2747_s24 }
0x1899   :  { %v1295_v43 = vpop.permute.xlu1 %1294 }
0x189a   :  { %v1297_v44 = vmul.f32 %v1295_v43, %v1279_v32 }
0x189c   :  { %1301 = vrot.lane.b32.xlu1 %v1297_v44, %s2748_s25 }
0x190e   :  { %v1302_v46 = vpop.permute.xlu1 %1301 }
0x190f   :  { %2302 = vmatmul.mubr.msk.f32.vlgmr.msra.gmra.mrb[16].mxu0 %vm98_vm1, %v1302_v46  ;;  %v1067_v46 = vadd.f32 %v2994_v19, %v3032_v45 }
0x1910   :  { %2452 = vmatpush3.bf16.msra.mxu0 %v3003_v33  ;;  %2323 = vmatprep.mubr.msk.f32.mxu0 %vm2745_vm0, %v2746_v2 }
0x1911   :  { %2453 = vmatprep.subr.bf16.mxu0 %v2744_v1 }
0x1914   :  { %2455 = vmatpush3.bf16.msra.mxu0 %v3007_v36 }
0x1915   :  { %2462 = vmatprep.subr.bf16.mxu0 %v2744_v1 }
0x19e2   :  { %v1371_v6 = vpop.f32.mrb[16].mxu0 }
0x19e3   :  { %v1375_v48 = vadd.f32 %v1371_v6, %v1052_v47  ;;  %v2303_v49 = vpop.f32.mrb[17].mxu0 }
0x19e5   :  { %2556 = vtanh.f32 %v1375_v48  ;;  %v1376_v51 = vmul.f32 0.5, %v1375_v48 }
0x19e7   :  { %2558 = vtanh.f32 %v1376_v51 }
0x19ef   :  { %v2557_v50 = vpop.eup %2556 }
0x19f0   :  { %1383 = vrot.lane.b32.xlu0 %v2557_v50, %s2747_s24 }
0x19f1   :  { %v2559_v8 = vpop.eup %2558 }
0x19f2   :  { %v1378_v52 = vmul.f32 0.5, %v2559_v8 }
0x19f4   :  { %v1379_v53 = vadd.f32 0.5, %v1378_v52 }
0x19f6   :  { %v1381_v56 = vmul.f32 %v1379_v53, %v1291_v39 }
0x1a62   :  { %v1384_v54 = vpop.permute.xlu0 %1383 }
0x1a63   :  { %v1386_v55 = vmul.f32 %v1384_v54, %v1379_v53 }
0x1a65   :  { %1388 = vrot.lane.b32.xlu1 %v1386_v55, %s2747_s24 }
0x1ad7   :  { %v1389_v57 = vpop.permute.xlu1 %1388 }
0x1ad8   :  { %v1391_v58 = vadd.f32 %v1389_v57, %v1381_v56 }
0x1ada   :  { %2560 = vtanh.f32 %v1391_v58 }
0x1ae4   :  { %v2561_v18 = vpop.eup %2560 }
0x1ae5   :  { %1394 = vrot.lane.b32.xlu0 %v2561_v18, %s2747_s24  ;;  %v1072_v18 = vadd.f32 %v3032_v45, %v3065_v42 }
0x1b57   :  { %v1395_v59 = vpop.permute.xlu0 %1394 }
0x1b58   :  { %v1397_v60 = vmul.f32 %v1395_v59, %v1379_v53 }
0x1b5a   :  { %1401 = vrot.lane.b32.xlu1 %v1397_v60, %s2748_s25 }
0x1bcc   :  { %v1402_v61 = vpop.permute.xlu1 %1401 }
0x1bcd   :  { %2313 = vmatmul.mubr.msk.f32.vlgmr.msra.gmra.mrb[12].mxu1 %vm98_vm1, %v1402_v61 }
0x1bce   :  { %2458 = vmatpush3.bf16.msra.mxu1 %v3003_v33  ;;  %2334 = vmatprep.mubr.msk.f32.mxu1 %vm2745_vm0, %v2746_v2 }
0x1bcf   :  { %2459 = vmatprep.subr.bf16.mxu1 %v2744_v1 }
0x1bd2   :  { %2461 = vmatpush3.bf16.msra.mxu1 %v3007_v36 }
0x1bd3   :  { %2468 = vmatprep.subr.bf16.mxu1 %v2744_v1 }
0x1ca0   :  { %v1471_v63 = vpop.f32.mrb[12].mxu1 }
0x1ca1   :  { %v1475_v0 = vadd.f32 %v1471_v63, %v1057_v62  ;;  %v2314_v3 = vpop.f32.mrb[13].mxu1 }
0x1ca3   :  { %2562 = vtanh.f32 %v1475_v0  ;;  %v1476_v5 = vmul.f32 0.5, %v1475_v0 }
0x1ca5   :  { %2564 = vtanh.f32 %v1476_v5 }
0x1cad   :  { %v2563_v4 = vpop.eup %2562 }
0x1cae   :  { %1483 = vrot.lane.b32.xlu0 %v2563_v4, %s2747_s24 }
0x1caf   :  { %v2565_v7 = vpop.eup %2564 }
0x1cb0   :  { %v1478_v9 = vmul.f32 0.5, %v2565_v7 }
0x1cb2   :  { %v1479_v10 = vadd.f32 0.5, %v1478_v9 }
0x1cb4   :  { %v1481_v13 = vmul.f32 %v1479_v10, %v1391_v58 }
0x1d20   :  { %v1484_v11 = vpop.permute.xlu0 %1483 }
0x1d21   :  { %v1486_v12 = vmul.f32 %v1484_v11, %v1479_v10 }
0x1d23   :  { %1488 = vrot.lane.b32.xlu1 %v1486_v12, %s2747_s24 }
0x1d95   :  { %v1489_v17 = vpop.permute.xlu1 %1488 }
0x1d96   :  { %v1491_v21 = vadd.f32 %v1489_v17, %v1481_v13  ;;  %v1077_v17 = vadd.f32 %v3063_v40, %v3032_v45  ;;  %v1910_v45 = vld [vmem:[%s3200_s6] sm:$0xff]  ;;  %v1911_v40 = vld [vmem:[%s3200_s6 + $0x8] sm:$0xff] }
0x1d98   :  { %2566 = vtanh.f32 %v1491_v21 }
0x1da2   :  { %v2567_v16 = vpop.eup %2566 }
0x1da3   :  { %1494 = vrot.lane.b32.xlu0 %v2567_v16, %s2747_s24 }
0x1e15   :  { %v1495_v22 = vpop.permute.xlu0 %1494 }
0x1e16   :  { %v1497_v23 = vmul.f32 %v1495_v22, %v1479_v10 }
0x1e18   :  { %1501 = vrot.lane.b32.xlu1 %v1497_v23, %s2748_s25 }
0x1e8a   :  { %v1502_v24 = vpop.permute.xlu1 %1501 }
0x1e8b   :  { %2324 = vmatmul.mubr.msk.f32.vlgmr.msra.gmra.mrb[18].mxu0 %vm98_vm1, %v1502_v24 }
0x1e8c   :  { %2464 = vmatpush3.bf16.msra.mxu0 %v3003_v33  ;;  %2345 = vmatprep.mubr.msk.f32.mxu0 %vm2745_vm0, %v2746_v2 }
0x1e8d   :  { %2465 = vmatprep.subr.bf16.mxu0 %v2744_v1 }
0x1e90   :  { %2467 = vmatpush3.bf16.msra.mxu0 %v3007_v36 }
0x1e91   :  { %2474 = vmatprep.subr.bf16.mxu0 %v2744_v1 }
0x1f5e   :  { %v1571_v26 = vpop.f32.mrb[18].mxu0 }
0x1f5f   :  { %v1575_v27 = vadd.f32 %v1571_v26, %v1062_v25  ;;  %v2325_v28 = vpop.f32.mrb[19].mxu0 }
0x1f61   :  { %2568 = vtanh.f32 %v1575_v27  ;;  %v1576_v30 = vmul.f32 0.5, %v1575_v27 }
0x1f63   :  { %2570 = vtanh.f32 %v1576_v30 }
0x1f6b   :  { %v2569_v29 = vpop.eup %2568 }
0x1f6c   :  { %1583 = vrot.lane.b32.xlu0 %v2569_v29, %s2747_s24 }
0x1f6d   :  { %v2571_v14 = vpop.eup %2570 }
0x1f6e   :  { %v1578_v31 = vmul.f32 0.5, %v2571_v14 }
0x1f70   :  { %v1579_v32 = vadd.f32 0.5, %v1578_v31 }
0x1f72   :  { %v1581_v37 = vmul.f32 %v1579_v32, %v1491_v21 }
0x1fde   :  { %v1584_v34 = vpop.permute.xlu0 %1583 }
0x1fdf   :  { %v1586_v35 = vmul.f32 %v1584_v34, %v1579_v32  ;;  %v2475_v34 = vpack.c.bf16 %v1911_v40, %v1910_v45 }
0x1fe1   :  { %1588 = vrot.lane.b32.xlu1 %v1586_v35, %s2747_s24  ;;  %v1913_v35 = vld [vmem:[%s3200_s6 + $0x18] sm:$0xff] }
0x2053   :  { %v1589_v38 = vpop.permute.xlu1 %1588 }
0x2054   :  { %v1591_v39 = vadd.f32 %v1589_v38, %v1581_v37 }
0x2056   :  { %2572 = vtanh.f32 %v1591_v39 }
0x2060   :  { %v2573_v20 = vpop.eup %2572 }
0x2061   :  { %1594 = vrot.lane.b32.xlu0 %v2573_v20, %s2747_s24 }
0x20d3   :  { %v1595_v41 = vpop.permute.xlu0 %1594 }
0x20d4   :  { %v1597_v43 = vmul.f32 %v1595_v41, %v1579_v32  ;;  %v1912_v32 = vld [vmem:[%s3200_s6 + $0x10] sm:$0xff]  ;;  %s2750_s6 = smov [#allocation13]  }
0x20d5   :  { %v2478_v37 = vpack.c.bf16 %v1913_v35, %v1912_v32  ;;  %s2006_s3 = sshll.u32 %s2750_s6, 4  ;;  %s2007_s3 = int_to_ptr.vmem [resolvable:$true] %s2006_s3 }
0x20d6   :  { %1601 = vrot.lane.b32.xlu1 %v1597_v43, %s2748_s25  ;;  %s2682_s7 = scalar_lea.vmem %s2007_s3, 256  ;;  %p2687_p5 = scmp.lt.s32.totalorder %s2007_s3, %s2007_s3 }
0x20d7   :  { %p2683_p4 = scmp.ne.s32.totalorder %s2007_s3, %s2682_s7  ;;  %p2688_p6 = scmp.lt.s32.totalorder %s2682_s7, %s2682_s7 }
0x20d9   :  { %p2689_p7 = por %p2688_p6, %p2687_p5 }
0x20db   :  { %p2690_p8 = pnand %p2689_p7, %p2683_p4 }
0x2148   :  { %v1602_v44 = vpop.permute.xlu1 %1601 }
0x2149   :  { %2335 = vmatmul.mubr.msk.f32.vlgmr.msra.gmra.mrb[14].mxu1 %vm98_vm1, %v1602_v44 }
0x214a   :  { %2470 = vmatpush3.bf16.msra.mxu1 %v3003_v33  ;;  %2356 = vmatprep.mubr.msk.f32.mxu1 %vm2745_vm0, %v2746_v2 }
0x214b   :  { %2471 = vmatprep.subr.bf16.mxu1 %v2744_v1 }
0x214e   :  { %2473 = vmatpush3.bf16.msra.mxu1 %v3007_v36 }
0x221c   :  { %v1671_v47 = vpop.f32.mrb[14].mxu1 }
0x221d   :  { %v1675_v6 = vadd.f32 %v1671_v47, %v1067_v46  ;;  %v2336_v48 = vpop.f32.mrb[15].mxu1 }
0x221f   :  { %2574 = vtanh.f32 %v1675_v6  ;;  %v1676_v50 = vmul.f32 0.5, %v1675_v6 }
0x2221   :  { %2576 = vtanh.f32 %v1676_v50 }
0x2229   :  { %v2575_v49 = vpop.eup %2574 }
0x222a   :  { %1683 = vrot.lane.b32.xlu0 %v2575_v49, %s2747_s24 }
0x222b   :  { %v2577_v33 = vpop.eup %2576 }
0x222c   :  { %v1678_v51 = vmul.f32 0.5, %v2577_v33 }
0x222e   :  { %v1679_v8 = vadd.f32 0.5, %v1678_v51 }
0x2230   :  { %v1681_v36 = vmul.f32 %v1679_v8, %v1591_v39 }
0x229c   :  { %v1684_v52 = vpop.permute.xlu0 %1683 }
0x229d   :  { %v1686_v53 = vmul.f32 %v1684_v52, %v1679_v8 }
0x229f   :  { %1688 = vrot.lane.b32.xlu1 %v1686_v53, %s2747_s24 }
0x2311   :  { %v1689_v54 = vpop.permute.xlu1 %1688 }
0x2312   :  { %v1691_v55 = vadd.f32 %v1689_v54, %v1681_v36 }
0x2314   :  { %2578 = vtanh.f32 %v1691_v55 }
0x231e   :  { %v2579_v19 = vpop.eup %2578 }
0x231f   :  { %1694 = vrot.lane.b32.xlu0 %v2579_v19, %s2747_s24 }
0x2391   :  { %v1695_v56 = vpop.permute.xlu0 %1694 }
0x2392   :  { %v1697_v57 = vmul.f32 %v1695_v56, %v1679_v8 }
0x2394   :  { %1701 = vrot.lane.b32.xlu1 %v1697_v57, %s2748_s25 }
0x2406   :  { %v1702_v58 = vpop.permute.xlu1 %1701 }
0x2407   :  { %2346 = vmatmul.mubr.msk.f32.vlgmr.msra.gmra.mrb[20].mxu0 %vm98_vm1, %v1702_v58 }
0x2408   :  { %2367 = vmatprep.mubr.msk.f32.mxu0 %vm2745_vm0, %v2746_v2  ;;  %2476 = vmatpush3.bf16.msra.mxu0 %v2475_v34 }
0x2409   :  { %2477 = vmatprep.subr.bf16.mxu0 %v2744_v1 }
0x240c   :  { %2479 = vmatpush3.bf16.msra.mxu0 %v2478_v37 }
0x24da   :  { %v1771_v59 = vpop.f32.mrb[20].mxu0 }
0x24db   :  { %v1775_v60 = vadd.f32 %v1771_v59, %v1072_v18  ;;  %v2347_v61 = vpop.f32.mrb[21].mxu0 }
0x24dd   :  { %2580 = vtanh.f32 %v1775_v60  ;;  %v1776_v63 = vmul.f32 0.5, %v1775_v60 }
0x24df   :  { %2582 = vtanh.f32 %v1776_v63 }
0x24e7   :  { %v2581_v62 = vpop.eup %2580 }
0x24e8   :  { %1783 = vrot.lane.b32.xlu0 %v2581_v62, %s2747_s24 }
0x24e9   :  { %v2583_v0 = vpop.eup %2582 }
0x24ea   :  { %v1778_v3 = vmul.f32 0.5, %v2583_v0 }
0x24ec   :  { %v1779_v4 = vadd.f32 0.5, %v1778_v3 }
0x24ee   :  { %v1781_v2 = vmul.f32 %v1779_v4, %v1691_v55 }
0x255a   :  { %v1784_v5 = vpop.permute.xlu0 %1783 }
0x255b   :  { %v1786_v7 = vmul.f32 %v1784_v5, %v1779_v4 }
0x255d   :  { %1788 = vrot.lane.b32.xlu1 %v1786_v7, %s2747_s24 }
0x25cf   :  { %v1789_v9 = vpop.permute.xlu1 %1788 }
0x25d0   :  { %v1791_v10 = vadd.f32 %v1789_v9, %v1781_v2 }
0x25d2   :  { %2584 = vtanh.f32 %v1791_v10 }
0x25dc   :  { %v2585_v42 = vpop.eup %2584 }
0x25dd   :  { %1794 = vrot.lane.b32.xlu0 %v2585_v42, %s2747_s24 }
0x264f   :  { %v1795_v11 = vpop.permute.xlu0 %1794 }
0x2650   :  { %v1797_v12 = vmul.f32 %v1795_v11, %v1779_v4 }
0x2652   :  { %1801 = vrot.lane.b32.xlu1 %v1797_v12, %s2748_s25 }
0x26c4   :  { %v1802_v13 = vpop.permute.xlu1 %1801 }
0x26c5   :  { %2357 = vmatmul.mubr.msk.f32.vlgmr.msra.gmra.mrb[16].mxu1 %vm98_vm1, %v1802_v13 }
0x2798   :  { %v1871_v21 = vpop.f32.mrb[16].mxu1 }
0x2799   :  { %v1875_v16 = vadd.f32 %v1871_v21, %v1077_v17  ;;  %v2358_v22 = vpop.f32.mrb[17].mxu1 }
0x279b   :  { %2586 = vtanh.f32 %v1875_v16  ;;  %v1876_v24 = vmul.f32 0.5, %v1875_v16 }
0x279d   :  { %2588 = vtanh.f32 %v1876_v24 }
0x27a5   :  { %v2587_v23 = vpop.eup %2586 }
0x27a6   :  { %1883 = vrot.lane.b32.xlu0 %v2587_v23, %s2747_s24 }
0x27a7   :  { %v2589_v25 = vpop.eup %2588 }
0x27a8   :  { %v1878_v26 = vmul.f32 0.5, %v2589_v25 }
0x27aa   :  { %v1879_v27 = vadd.f32 0.5, %v1878_v26 }
0x27ac   :  { %v1881_v30 = vmul.f32 %v1879_v27, %v1791_v10 }
0x2818   :  { %v1884_v28 = vpop.permute.xlu0 %1883 }
0x2819   :  { %v1886_v29 = vmul.f32 %v1884_v28, %v1879_v27 }
0x281b   :  { %1888 = vrot.lane.b32.xlu1 %v1886_v29, %s2747_s24 }
0x288d   :  { %v1889_v14 = vpop.permute.xlu1 %1888 }
0x288e   :  { %v1891_v31 = vadd.f32 %v1889_v14, %v1881_v30 }
0x2890   :  { %2590 = vtanh.f32 %v1891_v31 }
0x289a   :  { %v2591_v38 = vpop.eup %2590 }
0x289b   :  { %1894 = vrot.lane.b32.xlu0 %v2591_v38, %s2747_s24 }
0x289f   :  { %927 = vrot.lane.b32.xlu0 %v3047_v15, %s2749_s23 }
0x290d   :  { %v1895_v39 = vpop.permute.xlu0 %1894 }
0x290e   :  { %v1897_v20 = vmul.f32 %v1895_v39, %v1879_v27 }
0x2910   :  { %1899 = vrot.lane.b32.xlu1 %v1897_v20, %s2748_s25 }
0x2911   :  { %v928_v41 = vpop.permute.xlu0 %927 }
0x2912   :  { %930 = vst.msk [vmem:[#allocation14] sm:$0xff] %vm98_vm1, %v928_v41 }
0x2914   :  { %1905 = vrot.lane.b32.xlu1 %v1891_v31, %s2749_s23 }
0x2982   :  { %v1900_v43 = vpop.permute.xlu1 %1899 }
0x2983   :  { %1903 = vst.msk [vmem:[#allocation13 + $0x8] sm:$0xff] %vm98_vm1, %v1900_v43  ;;  %2368 = vmatmul.mubr.msk.f32.vlgmr.msra.gmra.mrb[22].mxu0 %vm98_vm1, %v1900_v43 }
0x2986   :  { %v1906_v1 = vpop.permute.xlu1 %1905 }
0x2987   :  { %1909 = vst.msk [vmem:[#allocation14 + $0x8] sm:$0xff] %vm98_vm1, %v1906_v1 }
0x2988   :  { %2693 = shalt.err (!%p2690_p8)
}
0x2989   :  { %s2694_s28 = scalar_lea.hbm %s3203_s9, 256 }
0x298a   :  { %p2695_p9 = scmp.ne.s32.totalorder %s3203_s9, %s2694_s28  ;;  %p2698_p10 = scmp.lt.u32.totalorder %s2694_s28, %s3203_s9 }
0x298c   :  { %p2700_p11 = pnand %p2698_p10, %p2695_p9 }
0x298e   :  { %2703 = shalt.err (!%p2700_p11)
}
0x298f   :  { %2012 = dma.vmem_to_hbm [thread:$0]  %s2007_s3, 256, %s3203_s9, [#allocation7], %s2738_s26, %s2738_s26, %s2739_s27  }
0x2990   :  { %s2704_s13 = scalar_lea.vmem %s3154_s5, 256  ;;  %p2709_p13 = scmp.lt.s32.totalorder %s3154_s5, %s3154_s5 }
0x2991   :  { %p2705_p12 = scmp.ne.s32.totalorder %s3154_s5, %s2704_s13  ;;  %p2710_p0 = scmp.lt.s32.totalorder %s2704_s13, %s2704_s13 }
0x2993   :  { %p2711_p1 = por %p2710_p0, %p2709_p13 }
0x2995   :  { %p2712_p2 = pnand %p2711_p1, %p2705_p12 }
0x2997   :  { %2715 = shalt.err (!%p2712_p2)
}
0x2998   :  { %s2716_s4 = scalar_lea.hbm %s3204_s10, 256 }
0x2999   :  { %p2717_p3 = scmp.ne.s32.totalorder %s3204_s10, %s2716_s4  ;;  %p2720_p4 = scmp.lt.u32.totalorder %s2716_s4, %s3204_s10 }
0x299b   :  { %p2722_p5 = pnand %p2720_p4, %p2717_p3 }
0x299d   :  { %2725 = shalt.err (!%p2722_p5)
}
0x299e   :  { %2024 = dma.vmem_to_hbm [thread:$0]  %s3154_s5, 256, %s3204_s10, [#allocation15], %s2738_s26, %s2738_s26, %s2739_s27   ;;  %v2064_v15 = vld [vmem:[#allocation4] ss:$0 sm:$0xff]  ;;  %vm1997_vm2 = vcmask 7168  }
0x2a56   :  { %v1989_v44 = vpop.f32.mrb[22].mxu0 }
0x2a57   :  { %v1990_v46 = vadd.f32 %v2064_v15, %v1989_v44  ;;  %v2369_v47 = vpop.f32.mrb[23].mxu0 }
0x2a59   :  { %v1993_v6 = vmul.f32 0.5, %v1990_v46 }
0x2a5b   :  { %2592 = vtanh.f32 %v1993_v6 }
0x2a65   :  { %v2593_v48 = vpop.eup %2592 }
0x2a66   :  { %v1995_v49 = vmul.f32 0.5, %v2593_v48 }
0x2a68   :  { %v1996_v50 = vadd.f32 0.5, %v1995_v49 }
0x2a6a   :  { %1998 = vst.msk [vmem:[%s3202_s8] sm:$0xff] %vm1997_vm2, %v1996_v50 }
0x2a6b   :  { %2732 = dma.done.wait [#allocation7], 256  }
0x2a6c   :  { %2733 = vsyncadd [#allocation7], 4294967040 }
0x2a6d   :  { %2734 = dma.done.wait [#allocation15], 256  }
0x2a6e   :  { %2735 = vsyncadd [#allocation15], 4294967040 }
0x2a6f   :  { %2033 = vsyncpa [#allocation6], 1 }
0x2a70   :  { %2034 = vsyncpa [#allocation9], 1 }
0x2a71   :  { %2035 = vsyncpa [#allocation12], 1 }
0x2a72   :  { %2036 = vsyncpa [#allocation7], 1 }
0x2a73   :  { %2037 = vsyncpa [#allocation15], 1 }

</bundles_post_ra>
